<compile_context>
chip_gen: v7x
topology: tpu7x:2x2x1
jax: 0.10.0
libtpu: 0.0.40
codegen_flags: <defaults>
</compile_context>

<pallas_src>
import functools

import jax
import jax.numpy as jnp
from jax.experimental import pallas as pl
from jax.experimental.pallas import tpu as pltpu


# ----------------------------------------------------------------------------
# Pallas kernels (all compute: matmul + bias + activation, fused)
# ----------------------------------------------------------------------------
def _encoder_kernel(a_ref, w1_ref, b1_ref, w2_ref, b2_ref, o_ref):
    """Fused encoder: relu(relu(A @ W1 + b1) @ W2 + b2) in a single kernel."""
    h = jnp.dot(a_ref[...], w1_ref[...], preferred_element_type=jnp.float32)
    h = jnp.maximum(h + b1_ref[...], 0.0)
    o = jnp.dot(h.astype(jnp.bfloat16), w2_ref[...],
                preferred_element_type=jnp.float32)
    o_ref[...] = jnp.maximum(o + b2_ref[...], 0.0)


def _mm_bias_act_kernel(a_ref, w_ref, b_ref, o_ref, *, act):
    acc = jnp.dot(a_ref[...], w_ref[...], preferred_element_type=jnp.float32)
    acc = acc + b_ref[...]
    if act == "relu":
        acc = jnp.maximum(acc, 0.0)
    elif act == "tanh":
        acc = jnp.tanh(acc)
    o_ref[...] = acc.astype(o_ref.dtype)


_ARB = pltpu.CompilerParams(dimension_semantics=("arbitrary",))


def encoder_pallas(a, w1, b1, w2, b2):
    """a: (M, K) bf16, w1: (K, N1) bf16, w2: (N1, N2) bf16, biases f32 -> (M, N2) f32."""
    M, K = a.shape
    n1 = w1.shape[1]
    n2 = w2.shape[1]
    return pl.pallas_call(
        _encoder_kernel,
        out_shape=jax.ShapeDtypeStruct((M, n2), jnp.float32),
        grid=(1,),
        in_specs=[
            pl.BlockSpec((M, K), lambda i: (0, 0)),
            pl.BlockSpec((K, n1), lambda i: (0, 0)),
            pl.BlockSpec((1, n1), lambda i: (0, 0)),
            pl.BlockSpec((n1, n2), lambda i: (0, 0)),
            pl.BlockSpec((1, n2), lambda i: (0, 0)),
        ],
        out_specs=pl.BlockSpec((M, n2), lambda i: (0, 0)),
        compiler_params=_ARB,
    )(a, w1, b1.reshape(1, n1), w2, b2.reshape(1, n2))


def matmul_bias_act(a, w, b, act):
    """a: (M, K) bf16, w: (K, N) bf16, b: (N,) f32 -> act(a @ w + b): (M, N) f32."""
    M, K = a.shape
    N = w.shape[1]
    kern = functools.partial(_mm_bias_act_kernel, act=act)
    return pl.pallas_call(
        kern,
        out_shape=jax.ShapeDtypeStruct((M, N), jnp.float32),
        grid=(1,),
        in_specs=[
            pl.BlockSpec((M, K), lambda i: (0, 0)),
            pl.BlockSpec((K, N), lambda i: (0, 0)),
            pl.BlockSpec((1, N), lambda i: (0, 0)),
        ],
        out_specs=pl.BlockSpec((M, N), lambda i: (0, 0)),
        compiler_params=_ARB,
    )(a, w, b.reshape(1, N))


# ----------------------------------------------------------------------------
# Glue: patch-matrix construction (plain JAX slices/reshapes; all tiny)
# ----------------------------------------------------------------------------
def _encoder_patches(x_nchw):
    """im2col for Conv2d(k=8, s=4) directly from NCHW.

    Exploits stride=4 / k=8: every 8x8 patch is a 2x2 grid of aligned 4x4 blocks, so
    only 4 slices are needed (vs 64 for generic im2col). Row m=(n,oy,ox), column
    k=(a, ys, b, xs, ci) with dy = 4a+ys, dx = 4b+xs.
    """
    n, c, h, w = x_nchw.shape
    ho = (h - 8) // 4 + 1
    wo = (w - 8) // 4 + 1
    xb = x_nchw.reshape(n, c, h // 4, 4, w // 4, 4)      # (n, ci, yblk, ys, xblk, xs)
    cols = [xb[:, :, a:a + ho, :, b:b + wo, :] for a in (0, 1) for b in (0, 1)]
    st = jnp.stack(cols, axis=0).reshape(2, 2, n, c, ho, 4, wo, 4)
    st = jnp.transpose(st, (2, 4, 6, 0, 5, 1, 7, 3))     # (n, oy, ox, a, ys, b, xs, ci)
    return st.reshape(n * ho * wo, 64 * c), ho, wo


def _conv1_wmat(w):
    """Conv2d weight (co, ci, 8, 8) -> (64*ci, co) matrix matching _encoder_patches."""
    co, ci = w.shape[0], w.shape[1]
    wr = w.reshape(co, ci, 2, 4, 2, 4)                   # (co, ci, a, ys, b, xs)
    wr = jnp.transpose(wr, (2, 3, 4, 5, 1, 0))           # (a, ys, b, xs, ci, co)
    return wr.reshape(64 * ci, co)


def _deconv_patches(x_nhwc):
    """2x2 / stride-1 im2col over the zero-padded input for a stride-2 transposed conv
    in sub-pixel (phase) form. Row m=(n,j,i), column k=(a, b, ci)."""
    n, h, w, c = x_nhwc.shape
    xp = jnp.pad(x_nhwc, ((0, 0), (1, 1), (1, 1), (0, 0)))
    ho, wo = h + 1, w + 1
    cols = [xp[:, a:a + ho, b:b + wo, :] for a in (0, 1) for b in (0, 1)]
    st = jnp.stack(cols, axis=0).reshape(2, 2, n, ho, wo, c)
    st = jnp.transpose(st, (2, 3, 4, 0, 1, 5))           # (n, j, i, a, b, ci)
    return st.reshape(n * ho * wo, 4 * c), ho, wo


def _deconv_wmat(w):
    """ConvTranspose2d weight (ci, co, kh, kw), kh,kw <= 4, stride 2 -> (4*ci, 4*co)
    matrix with rows (a, b, ci) and cols (py, px, co), so that
    out[n, 2j+py, 2i+px, co] = (patches @ Wmat)[(n,j,i), (py,px,co)]."""
    ci, co, kh, kw = w.shape
    wp = jnp.pad(w, ((0, 0), (0, 0), (0, 4 - kh), (0, 4 - kw)))
    wr = wp.reshape(ci, co, 2, 2, 2, 2)                  # (ci, co, u, py, v, px); ky=2u+py
    wr = wr[:, :, ::-1, :, ::-1, :]                      # u -> a = 1-u, v -> b = 1-v
    wr = jnp.transpose(wr, (2, 4, 0, 3, 5, 1))           # (a, b, ci, py, px, co)
    return wr.reshape(4 * ci, 4 * co)


def _deconv_unphase(out_mat, n, ho, wo, co):
    """(n*ho*wo, 4*co) with cols (py, px, co) -> NHWC (n, 2*ho, 2*wo, co)."""
    o = out_mat.reshape(n, ho, wo, 2, 2, co)
    o = jnp.transpose(o, (0, 1, 3, 2, 4, 5))             # (n, j, py, i, px, co)
    return o.reshape(n, 2 * ho, 2 * wo, co)


# ----------------------------------------------------------------------------
# Deterministic parameter init (xavier_normal_ on weights, like init_weights)
# ----------------------------------------------------------------------------
def _xavier_normal(key, shape, fan_in, fan_out):
    std = (2.0 / (fan_in + fan_out)) ** 0.5
    return std * jax.random.normal(key, shape, dtype=jnp.float32)


def make_params(seed=0):
    keys = jax.random.split(jax.random.PRNGKey(seed), 8)
    p = {}
    # Conv2d(2, 8, k=8, s=4): weight (8, 2, 8, 8)
    p["w1"] = _xavier_normal(keys[0], (8, 2, 8, 8), fan_in=2 * 64, fan_out=8 * 64)
    p["b1"] = 0.01 * jax.random.normal(keys[1], (8,), dtype=jnp.float32)
    # Conv2d(8, 16, k=1): weight (16, 8, 1, 1)
    p["w2"] = _xavier_normal(keys[2], (16, 8, 1, 1), fan_in=8, fan_out=16)
    p["b2"] = 0.01 * jax.random.normal(keys[3], (16,), dtype=jnp.float32)
    # ConvTranspose2d(16, 8, k=3, s=2): weight (16, 8, 3, 3)
    p["w3"] = _xavier_normal(keys[4], (16, 8, 3, 3), fan_in=8 * 9, fan_out=16 * 9)
    p["b3"] = 0.01 * jax.random.normal(keys[5], (8,), dtype=jnp.float32)
    # ConvTranspose2d(8, 2, k=4, s=2): weight (8, 2, 4, 4)
    p["w4"] = _xavier_normal(keys[6], (8, 2, 4, 4), fan_in=2 * 16, fan_out=8 * 16)
    p["b4"] = 0.01 * jax.random.normal(keys[7], (2,), dtype=jnp.float32)
    return p


# ----------------------------------------------------------------------------
# Forward pass:  (enc, dec) = Autoencoder(x)      x: NCHW, C=2
# ----------------------------------------------------------------------------
@jax.jit
def autoencoder_forward(params, x_nchw):
    n = x_nchw.shape[0]
    bf16 = jnp.bfloat16

    # ---- fused encoder: Conv2d(2,8,k=8,s=4)+ReLU -> Conv2d(8,16,k=1)+ReLU ----
    a1, ho, wo = _encoder_patches(x_nchw)                # (n*7*7, 128)
    m1 = a1.shape[0]
    m1p = -(-m1 // 16) * 16                              # pad rows for dense sublanes
    a1 = jnp.pad(a1, ((0, m1p - m1), (0, 0))).astype(bf16)
    w1m = _conv1_wmat(params["w1"]).astype(bf16)         # (128, 8)
    w2m = params["w2"].reshape(16, 8).T.astype(bf16)     # (8, 16)   [1x1 conv]
    enc_mat = encoder_pallas(a1, w1m, params["b1"], w2m, params["b2"])   # (m1p, 16) f32
    enc_nhwc = enc_mat[:m1].reshape(n, ho, wo, 16)
    enc = jnp.transpose(enc_nhwc, (0, 3, 1, 2))          # NCHW output

    # ---- ConvTranspose2d(16, 8, k=3, s=2) + ReLU  (sub-pixel phase decomposition) ----
    h_in, w_in = enc_nhwc.shape[1], enc_nhwc.shape[2]
    a3, h3, w3 = _deconv_patches(enc_nhwc)               # (n*8*8, 64)
    w3m = _deconv_wmat(params["w3"]).astype(bf16)        # (64, 32)
    b3m = jnp.tile(params["b3"], 4)                      # (32,)
    o3 = matmul_bias_act(a3.astype(bf16), w3m, b3m, "relu")             # (n*64, 32)
    d_nhwc = _deconv_unphase(o3, n, h3, w3, 8)
    d_nhwc = d_nhwc[:, :2 * (h_in - 1) + 3, :2 * (w_in - 1) + 3, :]     # crop (k=3 padded to 4)

    # ---- ConvTranspose2d(8, 2, k=4, s=2) + Tanh  (sub-pixel phase decomposition) ----
    a4, h4, w4 = _deconv_patches(d_nhwc)                 # (n*16*16, 32)
    w4m = _deconv_wmat(params["w4"]).astype(bf16)        # (32, 8)
    b4m = jnp.tile(params["b4"], 4)                      # (8,)
    o4 = matmul_bias_act(a4.astype(bf16), w4m, b4m, "tanh")             # (n*256, 8)
    dec_nhwc = _deconv_unphase(o4, n, h4, w4, 2)         # (n, 32, 32, 2); exact, no crop
    dec = jnp.transpose(dec_nhwc, (0, 3, 1, 2))          # NCHW output

    return enc, dec


# ----------------------------------------------------------------------------
# Pure-XLA f32 reference (used only for a loose numerical self-check)
# ----------------------------------------------------------------------------
def reference_forward(params, x):
    dn = ("NCHW", "OIHW", "NCHW")

    def conv(x, w, b, s):
        y = jax.lax.conv_general_dilated(x, w, (s, s), "VALID", dimension_numbers=dn)
        return y + b[None, :, None, None]

    def conv_t(x, w, b, s):
        ci, co, kh, kw = w.shape
        wf = jnp.transpose(w, (1, 0, 2, 3))[:, :, ::-1, ::-1]
        y = jax.lax.conv_general_dilated(
            x, wf, (1, 1), ((kh - 1, kh - 1), (kw - 1, kw - 1)),
            lhs_dilation=(s, s), dimension_numbers=dn)
        return y + b[None, :, None, None]

    h = jax.nn.relu(conv(x, params["w1"], params["b1"], 4))
    enc = jax.nn.relu(conv(h, params["w2"], params["b2"], 1))
    d = jax.nn.relu(conv_t(enc, params["w3"], params["b3"], 2))
    dec = jnp.tanh(conv_t(d, params["w4"], params["b4"], 2))
    return enc, dec


if __name__ == "__main__":
    key = jax.random.PRNGKey(0)
    # x: NCHW, batch=2, channels=2, spatial=32x32
    x = jax.random.normal(key, (2, 2, 32, 32), dtype=jnp.float32)
    params = make_params(seed=0)

    enc, dec = autoencoder_forward(params, x)
    enc = jax.block_until_ready(enc)
    dec = jax.block_until_ready(dec)

    # shape / range checks vs PyTorch semantics:
    #   enc: (2, 16, 7, 7)   [32 -> (32-8)/4+1 = 7, then 1x1 conv]
    #   dec: (2, 2, 32, 32)  [(7-1)*2+3 = 15, then (15-1)*2+4 = 32]
    assert enc.shape == (2, 16, 7, 7), enc.shape
    assert dec.shape == (2, 2, 32, 32), dec.shape
    assert bool(jnp.all(jnp.isfinite(enc))) and bool(jnp.all(jnp.isfinite(dec)))
    assert bool(jnp.all(enc >= 0.0))                      # ReLU output
    assert bool(jnp.all(jnp.abs(dec) <= 1.0 + 1e-6))      # Tanh output

    # loose numerical check vs pure-XLA f32 reference (operands are bf16 in the kernels)
    enc_ref, dec_ref = jax.jit(reference_forward)(params, x)
    assert float(jnp.max(jnp.abs(enc - enc_ref))) < 0.35
    assert float(jnp.max(jnp.abs(dec - dec_ref))) < 0.35

    print("KERNEL_OK")
</pallas_src>

<mosaic_0001>
module attributes {stable_mosaic.version = 11 : i64} {
  func.func @_encoder_kernel(%arg0: i32, %arg1: memref<112x128xbf16, #tpu.memory_space<vmem>>, %arg2: memref<128x8xbf16, #tpu.memory_space<vmem>>, %arg3: memref<1x8xf32, #tpu.memory_space<vmem>>, %arg4: memref<8x16xbf16, #tpu.memory_space<vmem>>, %arg5: memref<1x16xf32, #tpu.memory_space<vmem>>, %arg6: memref<112x16xf32, #tpu.memory_space<vmem>>) attributes {dimension_semantics = [#tpu.dimension_semantics<arbitrary>], iteration_bounds = array<i64: 1>, scalar_prefetch = 0 : i64, scratch_operands = 0 : i64, tpu.core_type = #tpu.core_type<tc>, window_params = [{pipeline_mode = #tpu.pipeline_mode<synchronous>, transform_indices = @transform_0, window_bounds = array<i64: 112, 128>}, {pipeline_mode = #tpu.pipeline_mode<synchronous>, transform_indices = @transform_1, window_bounds = array<i64: 128, 8>}, {pipeline_mode = #tpu.pipeline_mode<synchronous>, transform_indices = @transform_2, window_bounds = array<i64: 1, 8>}, {pipeline_mode = #tpu.pipeline_mode<synchronous>, transform_indices = @transform_3, window_bounds = array<i64: 8, 16>}, {pipeline_mode = #tpu.pipeline_mode<synchronous>, transform_indices = @transform_4, window_bounds = array<i64: 1, 16>}, {pipeline_mode = #tpu.pipeline_mode<synchronous>, transform_indices = @transform_5, window_bounds = array<i64: 112, 16>}]} {
    %c0 = arith.constant 0 : index
    %c0_0 = arith.constant 0 : index
    %0 = vector.load %arg1[%c0, %c0_0] : memref<112x128xbf16, #tpu.memory_space<vmem>>, vector<112x128xbf16>
    %c0_1 = arith.constant 0 : index
    %c0_2 = arith.constant 0 : index
    %1 = vector.load %arg2[%c0_1, %c0_2] : memref<128x8xbf16, #tpu.memory_space<vmem>>, vector<128x8xbf16>
    %cst = arith.constant dense<0.000000e+00> : vector<112x8xf32>
    %2 = tpu.matmul %0, %1, %cst {dimension_numbers = #tpu.dot_dimension_numbers<[1], [0], [0], [1], [0, 0, 1, 1], [], []>} : vector<112x128xbf16>, vector<128x8xbf16>, vector<112x8xf32> -> vector<112x8xf32>
    %c0_3 = arith.constant 0 : index
    %c0_4 = arith.constant 0 : index
    %3 = vector.load %arg3[%c0_3, %c0_4] : memref<1x8xf32, #tpu.memory_space<vmem>>, vector<1x8xf32>
    %4 = vector.broadcast %3 : vector<1x8xf32> to vector<112x8xf32>
    %5 = arith.addf %2, %4 : vector<112x8xf32>
    %cst_5 = arith.constant 0.000000e+00 : f32
    %6 = vector.broadcast %cst_5 : f32 to vector<112x8xf32>
    %7 = arith.maximumf %5, %6 : vector<112x8xf32>
    %8 = arith.truncf %7 : vector<112x8xf32> to vector<112x8xbf16>
    %c0_6 = arith.constant 0 : index
    %c0_7 = arith.constant 0 : index
    %9 = vector.load %arg4[%c0_6, %c0_7] : memref<8x16xbf16, #tpu.memory_space<vmem>>, vector<8x16xbf16>
    %cst_8 = arith.constant dense<0.000000e+00> : vector<112x16xf32>
    %10 = tpu.matmul %8, %9, %cst_8 {dimension_numbers = #tpu.dot_dimension_numbers<[1], [0], [0], [1], [0, 0, 1, 1], [], []>} : vector<112x8xbf16>, vector<8x16xbf16>, vector<112x16xf32> -> vector<112x16xf32>
    %c0_9 = arith.constant 0 : index
    %c0_10 = arith.constant 0 : index
    %11 = vector.load %arg5[%c0_9, %c0_10] : memref<1x16xf32, #tpu.memory_space<vmem>>, vector<1x16xf32>
    %12 = vector.broadcast %11 : vector<1x16xf32> to vector<112x16xf32>
    %13 = arith.addf %10, %12 : vector<112x16xf32>
    %cst_11 = arith.constant 0.000000e+00 : f32
    %14 = vector.broadcast %cst_11 : f32 to vector<112x16xf32>
    %15 = arith.maximumf %13, %14 : vector<112x16xf32>
    %c0_12 = arith.constant 0 : index
    %c0_13 = arith.constant 0 : index
    %16 = vector.load %arg6[%c0_12, %c0_13] : memref<112x16xf32, #tpu.memory_space<vmem>>, vector<112x16xf32>
    tpu.vector_store %arg6[%c0_12, %c0_13], %15 {strides = array<i32>} : memref<112x16xf32, #tpu.memory_space<vmem>>, vector<112x16xf32>,
    return
  }
  func.func @transform_0(%arg0: i32) -> (i32, i32) {
    %c0_i32 = arith.constant 0 : i32
    %c0_i32_0 = arith.constant 0 : i32
    %c0_i32_1 = arith.constant 0 : i32
    return %c0_i32, %c0_i32_0 : i32, i32
  }
  func.func @transform_1(%arg0: i32) -> (i32, i32) {
    %c0_i32 = arith.constant 0 : i32
    %c0_i32_0 = arith.constant 0 : i32
    %c0_i32_1 = arith.constant 0 : i32
    return %c0_i32, %c0_i32_0 : i32, i32
  }
  func.func @transform_2(%arg0: i32) -> (i32, i32) {
    %c0_i32 = arith.constant 0 : i32
    %c0_i32_0 = arith.constant 0 : i32
    %c0_i32_1 = arith.constant 0 : i32
    return %c0_i32, %c0_i32_0 : i32, i32
  }
  func.func @transform_3(%arg0: i32) -> (i32, i32) {
    %c0_i32 = arith.constant 0 : i32
    %c0_i32_0 = arith.constant 0 : i32
    %c0_i32_1 = arith.constant 0 : i32
    return %c0_i32, %c0_i32_0 : i32, i32
  }
  func.func @transform_4(%arg0: i32) -> (i32, i32) {
    %c0_i32 = arith.constant 0 : i32
    %c0_i32_0 = arith.constant 0 : i32
    %c0_i32_1 = arith.constant 0 : i32
    return %c0_i32, %c0_i32_0 : i32, i32
  }
  func.func @transform_5(%arg0: i32) -> (i32, i32) {
    %c0_i32 = arith.constant 0 : i32
    %c0_i32_0 = arith.constant 0 : i32
    %c0_i32_1 = arith.constant 0 : i32
    return %c0_i32, %c0_i32_0 : i32, i32
  }
}

module attributes {stable_mosaic.version = 11 : i64} {
  func.func @_mm_bias_act_kernel(%arg0: i32, %arg1: memref<128x64xbf16, #tpu.memory_space<vmem>>, %arg2: memref<64x32xbf16, #tpu.memory_space<vmem>>, %arg3: memref<1x32xf32, #tpu.memory_space<vmem>>, %arg4: memref<128x32xf32, #tpu.memory_space<vmem>>) attributes {dimension_semantics = [#tpu.dimension_semantics<arbitrary>], iteration_bounds = array<i64: 1>, scalar_prefetch = 0 : i64, scratch_operands = 0 : i64, tpu.core_type = #tpu.core_type<tc>, window_params = [{pipeline_mode = #tpu.pipeline_mode<synchronous>, transform_indices = @transform_0, window_bounds = array<i64: 128, 64>}, {pipeline_mode = #tpu.pipeline_mode<synchronous>, transform_indices = @transform_1, window_bounds = array<i64: 64, 32>}, {pipeline_mode = #tpu.pipeline_mode<synchronous>, transform_indices = @transform_2, window_bounds = array<i64: 1, 32>}, {pipeline_mode = #tpu.pipeline_mode<synchronous>, transform_indices = @transform_3, window_bounds = array<i64: 128, 32>}]} {
    %c0 = arith.constant 0 : index
    %c0_0 = arith.constant 0 : index
    %0 = vector.load %arg1[%c0, %c0_0] : memref<128x64xbf16, #tpu.memory_space<vmem>>, vector<128x64xbf16>
    %c0_1 = arith.constant 0 : index
    %c0_2 = arith.constant 0 : index
    %1 = vector.load %arg2[%c0_1, %c0_2] : memref<64x32xbf16, #tpu.memory_space<vmem>>, vector<64x32xbf16>
    %cst = arith.constant dense<0.000000e+00> : vector<128x32xf32>
    %2 = tpu.matmul %0, %1, %cst {dimension_numbers = #tpu.dot_dimension_numbers<[1], [0], [0], [1], [0, 0, 1, 1], [], []>} : vector<128x64xbf16>, vector<64x32xbf16>, vector<128x32xf32> -> vector<128x32xf32>
    %c0_3 = arith.constant 0 : index
    %c0_4 = arith.constant 0 : index
    %3 = vector.load %arg3[%c0_3, %c0_4] : memref<1x32xf32, #tpu.memory_space<vmem>>, vector<1x32xf32>
    %4 = vector.broadcast %3 : vector<1x32xf32> to vector<128x32xf32>
    %5 = arith.addf %2, %4 : vector<128x32xf32>
    %cst_5 = arith.constant 0.000000e+00 : f32
    %6 = vector.broadcast %cst_5 : f32 to vector<128x32xf32>
    %7 = arith.maximumf %5, %6 : vector<128x32xf32>
    %c0_6 = arith.constant 0 : index
    %c0_7 = arith.constant 0 : index
    %8 = vector.load %arg4[%c0_6, %c0_7] : memref<128x32xf32, #tpu.memory_space<vmem>>, vector<128x32xf32>
    tpu.vector_store %arg4[%c0_6, %c0_7], %7 {strides = array<i32>} : memref<128x32xf32, #tpu.memory_space<vmem>>, vector<128x32xf32>,
    return
  }
  func.func @transform_0(%arg0: i32) -> (i32, i32) {
    %c0_i32 = arith.constant 0 : i32
    %c0_i32_0 = arith.constant 0 : i32
    %c0_i32_1 = arith.constant 0 : i32
    return %c0_i32, %c0_i32_0 : i32, i32
  }
  func.func @transform_1(%arg0: i32) -> (i32, i32) {
    %c0_i32 = arith.constant 0 : i32
    %c0_i32_0 = arith.constant 0 : i32
    %c0_i32_1 = arith.constant 0 : i32
    return %c0_i32, %c0_i32_0 : i32, i32
  }
  func.func @transform_2(%arg0: i32) -> (i32, i32) {
    %c0_i32 = arith.constant 0 : i32
    %c0_i32_0 = arith.constant 0 : i32
    %c0_i32_1 = arith.constant 0 : i32
    return %c0_i32, %c0_i32_0 : i32, i32
  }
  func.func @transform_3(%arg0: i32) -> (i32, i32) {
    %c0_i32 = arith.constant 0 : i32
    %c0_i32_0 = arith.constant 0 : i32
    %c0_i32_1 = arith.constant 0 : i32
    return %c0_i32, %c0_i32_0 : i32, i32
  }
}

module attributes {stable_mosaic.version = 11 : i64} {
  func.func @_mm_bias_act_kernel(%arg0: i32, %arg1: memref<512x32xbf16, #tpu.memory_space<vmem>>, %arg2: memref<32x8xbf16, #tpu.memory_space<vmem>>, %arg3: memref<1x8xf32, #tpu.memory_space<vmem>>, %arg4: memref<512x8xf32, #tpu.memory_space<vmem>>) attributes {dimension_semantics = [#tpu.dimension_semantics<arbitrary>], iteration_bounds = array<i64: 1>, scalar_prefetch = 0 : i64, scratch_operands = 0 : i64, tpu.core_type = #tpu.core_type<tc>, window_params = [{pipeline_mode = #tpu.pipeline_mode<synchronous>, transform_indices = @transform_0, window_bounds = array<i64: 512, 32>}, {pipeline_mode = #tpu.pipeline_mode<synchronous>, transform_indices = @transform_1, window_bounds = array<i64: 32, 8>}, {pipeline_mode = #tpu.pipeline_mode<synchronous>, transform_indices = @transform_2, window_bounds = array<i64: 1, 8>}, {pipeline_mode = #tpu.pipeline_mode<synchronous>, transform_indices = @transform_3, window_bounds = array<i64: 512, 8>}]} {
    %c0 = arith.constant 0 : index
    %c0_0 = arith.constant 0 : index
    %0 = vector.load %arg1[%c0, %c0_0] : memref<512x32xbf16, #tpu.memory_space<vmem>>, vector<512x32xbf16>
    %c0_1 = arith.constant 0 : index
    %c0_2 = arith.constant 0 : index
    %1 = vector.load %arg2[%c0_1, %c0_2] : memref<32x8xbf16, #tpu.memory_space<vmem>>, vector<32x8xbf16>
    %cst = arith.constant dense<0.000000e+00> : vector<512x8xf32>
    %2 = tpu.matmul %0, %1, %cst {dimension_numbers = #tpu.dot_dimension_numbers<[1], [0], [0], [1], [0, 0, 1, 1], [], []>} : vector<512x32xbf16>, vector<32x8xbf16>, vector<512x8xf32> -> vector<512x8xf32>
    %c0_3 = arith.constant 0 : index
    %c0_4 = arith.constant 0 : index
    %3 = vector.load %arg3[%c0_3, %c0_4] : memref<1x8xf32, #tpu.memory_space<vmem>>, vector<1x8xf32>
    %4 = vector.broadcast %3 : vector<1x8xf32> to vector<512x8xf32>
    %5 = arith.addf %2, %4 : vector<512x8xf32>
    %6 = math.tanh %5 : vector<512x8xf32>
    %c0_5 = arith.constant 0 : index
    %c0_6 = arith.constant 0 : index
    %7 = vector.load %arg4[%c0_5, %c0_6] : memref<512x8xf32, #tpu.memory_space<vmem>>, vector<512x8xf32>
    tpu.vector_store %arg4[%c0_5, %c0_6], %6 {strides = array<i32>} : memref<512x8xf32, #tpu.memory_space<vmem>>, vector<512x8xf32>,
    return
  }
  func.func @transform_0(%arg0: i32) -> (i32, i32) {
    %c0_i32 = arith.constant 0 : i32
    %c0_i32_0 = arith.constant 0 : i32
    %c0_i32_1 = arith.constant 0 : i32
    return %c0_i32, %c0_i32_0 : i32, i32
  }
  func.func @transform_1(%arg0: i32) -> (i32, i32) {
    %c0_i32 = arith.constant 0 : i32
    %c0_i32_0 = arith.constant 0 : i32
    %c0_i32_1 = arith.constant 0 : i32
    return %c0_i32, %c0_i32_0 : i32, i32
  }
  func.func @transform_2(%arg0: i32) -> (i32, i32) {
    %c0_i32 = arith.constant 0 : i32
    %c0_i32_0 = arith.constant 0 : i32
    %c0_i32_1 = arith.constant 0 : i32
    return %c0_i32, %c0_i32_0 : i32, i32
  }
  func.func @transform_3(%arg0: i32) -> (i32, i32) {
    %c0_i32 = arith.constant 0 : i32
    %c0_i32_0 = arith.constant 0 : i32
    %c0_i32_1 = arith.constant 0 : i32
    return %c0_i32, %c0_i32_0 : i32, i32
  }
}

</mosaic_0001>

<bundles_post_ra>
// kernel: autoencoder_forward.3
= control target key start
LH: loop header
LB: loop body
LE: loop exit
PB: predicated region body
PF: predicated region fallthrough
CT: control target
= control target key end

     0   :  { %v552_v0 = vmov 0.0   ;;  %vm553_vm0 = vmmov 0   ;;  %vm288_vm1 = vcmask 1043456   ;;  %vm266_vm2 = vcmask 64512   ;;  %s770_s1 = inlined_call_operand.vmem [shape: bf16[128,8], index: 1, kind: input, shape index: {}]   ;;  %s771_s0 = inlined_call_operand.vmem [shape: bf16[112,128], index: 0, kind: input, shape index: {}]   ;;  %s772_s3 = inlined_call_operand.vmem [shape: bf16[8,16], index: 3, kind: input, shape index: {}]   ;;  %s773_s2 = inlined_call_operand.vmem [shape: f32[1,8], index: 2, kind: input, shape index: {}]   ;;  %s774_s4 = inlined_call_operand.vmem [shape: f32[1,16], index: 4, kind: input, shape index: {}]   ;;  %s775_s5 = inlined_call_operand.vmem [shape: f32[112,16], index: 5, kind: output, shape index: {}]  }
   0x1   :  { %461 = vmatprep.subr.bf16.mxu0 %v552_v0  ;;  %v537_v1 = vld [vmem:[%s770_s1] sm:$0xff]   ;;  %477 = vmatprep.mubr.msk.bf16.mxu0 %vm553_vm0, %v552_v0  ;;  %v538_v2 = vld [vmem:[%s770_s1 + $0x8] sm:$0xff]   ;;  %v539_v3 = vld [vmem:[%s770_s1 + $0x10] sm:$0xff]   ;;  %vm395_vm3 = vcmask 130048  }
   0x2   :  { %505 = vmatprep.subr.bf16.mxu1 %v552_v0  ;;  %507 = vmatprep.mubr.msk.bf16.mxu1 %vm553_vm0, %v552_v0  ;;  %v540_v4 = vld [vmem:[%s770_s1 + $0x18] sm:$0xff]   ;;  %v541_v5 = vld [vmem:[%s770_s1 + $0x20] sm:$0xff]   ;;  %v542_v6 = vld [vmem:[%s770_s1 + $0x28] sm:$0xff]  }
   0x3   :  { %462 = vmatpush3.bf16.msra.mxu0 %v537_v1  ;;  %v543_v7 = vld [vmem:[%s770_s1 + $0x30] sm:$0xff]   ;;  %v544_v8 = vld [vmem:[%s770_s1 + $0x38] sm:$0xff]   ;;  %v545_v9 = vld [vmem:[%s771_s0] sm:$0xff]  }
   0x4   :  { %463 = vmatprep.subr.bf16.mxu0 %v552_v0  ;;  %v546_v10 = vld [vmem:[%s771_s0 + $0x8] sm:$0xff]   ;;  %v547_v11 = vld [vmem:[%s771_s0 + $0x10] sm:$0xff]   ;;  %v548_v12 = vld [vmem:[%s771_s0 + $0x18] sm:$0xff]  }
   0x5   :  { %v549_v13 = vld [vmem:[%s771_s0 + $0x20] sm:$0xff]   ;;  %v550_v14 = vld [vmem:[%s771_s0 + $0x28] sm:$0xff]   ;;  %v551_v15 = vld [vmem:[%s771_s0 + $0x30] sm:$0xff]  }
   0x6   :  { %v258_v16 = vld [vmem:[%s772_s3] sm:$0xf] }
   0x7   :  { %464 = vmatpush3.bf16.msra.mxu0 %v538_v2  ;;  %v290_v17 = vsel %vm288_vm1, %v258_v16, 0  ;;  %v660_v18 = vld [vmem:[%s773_s2] ss:$0 sm:$0xff] }
   0x8   :  { %465 = vmatprep.subr.bf16.mxu0 %v552_v0  ;;  %506 = vmatpush3.bf16.msra.mxu1 %v290_v17 }
   0xb   :  { %466 = vmatpush3.bf16.msra.mxu0 %v539_v3 }
   0xc   :  { %467 = vmatprep.subr.bf16.mxu0 %v552_v0 }
   0xf   :  { %468 = vmatpush3.bf16.msra.mxu0 %v540_v4 }
  0x10   :  { %469 = vmatprep.subr.bf16.mxu0 %v552_v0 }
  0x13   :  { %470 = vmatpush3.bf16.msra.mxu0 %v541_v5 }
  0x14   :  { %471 = vmatprep.subr.bf16.mxu0 %v552_v0 }
  0x17   :  { %472 = vmatpush3.bf16.msra.mxu0 %v542_v6 }
  0x18   :  { %473 = vmatprep.subr.bf16.mxu0 %v552_v0 }
  0x1b   :  { %474 = vmatpush3.bf16.msra.mxu0 %v543_v7 }
  0x1c   :  { %475 = vmatprep.subr.bf16.mxu0 %v552_v0 }
  0x1f   :  { %476 = vmatpush3.bf16.msra.mxu0 %v544_v8 }
  0x22   :  { %478 = vmatmul.mubr.bf16.vlgmr.msra.gmra.mrb[0].mxu0 %v545_v9 }
  0x23   :  { %481 = vmatprep.mubr.msk.bf16.mxu0 %vm553_vm0, %v552_v0 }
  0x2a   :  { %482 = vmatmul.mubr.bf16.gmra.mrb[4].mxu0 %v546_v10 }
  0x2b   :  { %485 = vmatprep.mubr.msk.bf16.mxu0 %vm553_vm0, %v552_v0 }
  0x32   :  { %486 = vmatmul.mubr.bf16.gmra.mrb[8].mxu0 %v547_v11 }
  0x33   :  { %489 = vmatprep.mubr.msk.bf16.mxu0 %vm553_vm0, %v552_v0 }
  0x3a   :  { %490 = vmatmul.mubr.bf16.gmra.mrb[12].mxu0 %v548_v12 }
  0x3b   :  { %493 = vmatprep.mubr.msk.bf16.mxu0 %vm553_vm0, %v552_v0 }
  0x42   :  { %494 = vmatmul.mubr.bf16.gmra.mrb[16].mxu0 %v549_v13 }
  0x43   :  { %497 = vmatprep.mubr.msk.bf16.mxu0 %vm553_vm0, %v552_v0 }
  0x4a   :  { %498 = vmatmul.mubr.bf16.gmra.mrb[20].mxu0 %v550_v14 }
  0x4b   :  { %501 = vmatprep.mubr.msk.bf16.mxu0 %vm553_vm0, %v552_v0 }
  0x52   :  { %502 = vmatmul.mubr.bf16.gmra.mrb[24].mxu0 %v551_v15 }
  0xf5   :  { %v182_v19 = vpop.f32.mrb[0].mxu0 }
  0xf6   :  { %v183_v20 = vadd.f32 %v660_v18, %v182_v19  ;;  %v479_v21 = vpop.f32.mrb[1].mxu0 }
  0xf7   :  { %v185_v22 = vpop.f32.mrb[2].mxu0 }
  0xf8   :  { %v186_v23 = vadd.f32 %v660_v18, %v185_v22  ;;  %v480_v24 = vpop.f32.mrb[3].mxu0  ;;  %v237_v25 = vmax.f32 %v183_v20, 0.0  ;;  %v698_v20 = vld [vmem:[%s774_s4] ss:$0 sm:$0xff] }
  0xfa   :  { %v238_v26 = vmax.f32 %v186_v23, 0.0 }
  0xfc   :  { %v251_v27 = vpack.c.bf16 %v238_v26, %v237_v25 }
  0xfd   :  { %v190_v28 = vpop.f32.mrb[4].mxu0 }
  0xfe   :  { %v191_v29 = vadd.f32 %v660_v18, %v190_v28  ;;  %v483_v30 = vpop.f32.mrb[5].mxu0  ;;  %508 = vmatmul.mubr.msk.bf16.vlgmr.msra.gmra.mrb[0].mxu1 %vm266_vm2, %v251_v27 }
  0xff   :  { %v193_v31 = vpop.f32.mrb[6].mxu0  ;;  %511 = vmatprep.mubr.msk.bf16.mxu1 %vm553_vm0, %v552_v0 }
 0x100   :  { %v194_v32 = vadd.f32 %v660_v18, %v193_v31  ;;  %v484_v33 = vpop.f32.mrb[7].mxu0  ;;  %v239_v34 = vmax.f32 %v191_v29, 0.0 }
 0x102   :  { %v240_v35 = vmax.f32 %v194_v32, 0.0 }
 0x104   :  { %v252_v36 = vpack.c.bf16 %v240_v35, %v239_v34 }
 0x105   :  { %v198_v37 = vpop.f32.mrb[8].mxu0 }
 0x106   :  { %v199_v38 = vadd.f32 %v660_v18, %v198_v37  ;;  %v487_v39 = vpop.f32.mrb[9].mxu0  ;;  %512 = vmatmul.mubr.msk.bf16.gmra.mrb[4].mxu1 %vm266_vm2, %v252_v36 }
 0x107   :  { %v201_v40 = vpop.f32.mrb[10].mxu0  ;;  %515 = vmatprep.mubr.msk.bf16.mxu1 %vm553_vm0, %v552_v0 }
 0x108   :  { %v202_v41 = vadd.f32 %v660_v18, %v201_v40  ;;  %v488_v42 = vpop.f32.mrb[11].mxu0  ;;  %v241_v43 = vmax.f32 %v199_v38, 0.0 }
 0x10a   :  { %v242_v44 = vmax.f32 %v202_v41, 0.0 }
 0x10c   :  { %v253_v45 = vpack.c.bf16 %v242_v44, %v241_v43 }
 0x10d   :  { %v206_v46 = vpop.f32.mrb[12].mxu0 }
 0x10e   :  { %v207_v47 = vadd.f32 %v660_v18, %v206_v46  ;;  %v491_v48 = vpop.f32.mrb[13].mxu0  ;;  %516 = vmatmul.mubr.msk.bf16.gmra.mrb[8].mxu1 %vm266_vm2, %v253_v45 }
 0x10f   :  { %v209_v49 = vpop.f32.mrb[14].mxu0  ;;  %519 = vmatprep.mubr.msk.bf16.mxu1 %vm553_vm0, %v552_v0 }
 0x110   :  { %v210_v50 = vadd.f32 %v660_v18, %v209_v49  ;;  %v492_v51 = vpop.f32.mrb[15].mxu0  ;;  %v243_v52 = vmax.f32 %v207_v47, 0.0 }
 0x112   :  { %v244_v53 = vmax.f32 %v210_v50, 0.0 }
 0x114   :  { %v254_v54 = vpack.c.bf16 %v244_v53, %v243_v52 }
 0x115   :  { %v214_v55 = vpop.f32.mrb[16].mxu0 }
 0x116   :  { %v215_v56 = vadd.f32 %v660_v18, %v214_v55  ;;  %v495_v57 = vpop.f32.mrb[17].mxu0  ;;  %520 = vmatmul.mubr.msk.bf16.gmra.mrb[12].mxu1 %vm266_vm2, %v254_v54 }
 0x117   :  { %v217_v58 = vpop.f32.mrb[18].mxu0  ;;  %523 = vmatprep.mubr.msk.bf16.mxu1 %vm553_vm0, %v552_v0 }
 0x118   :  { %v218_v59 = vadd.f32 %v660_v18, %v217_v58  ;;  %v496_v60 = vpop.f32.mrb[19].mxu0  ;;  %v245_v61 = vmax.f32 %v215_v56, 0.0 }
 0x11a   :  { %v246_v62 = vmax.f32 %v218_v59, 0.0 }
 0x11c   :  { %v255_v63 = vpack.c.bf16 %v246_v62, %v245_v61 }
 0x11d   :  { %v222_v1 = vpop.f32.mrb[20].mxu0 }
 0x11e   :  { %v223_v2 = vadd.f32 %v660_v18, %v222_v1  ;;  %v499_v3 = vpop.f32.mrb[21].mxu0  ;;  %524 = vmatmul.mubr.msk.bf16.gmra.mrb[16].mxu1 %vm266_vm2, %v255_v63 }
 0x11f   :  { %v225_v4 = vpop.f32.mrb[22].mxu0  ;;  %527 = vmatprep.mubr.msk.bf16.mxu1 %vm553_vm0, %v552_v0 }
 0x120   :  { %v226_v5 = vadd.f32 %v660_v18, %v225_v4  ;;  %v500_v6 = vpop.f32.mrb[23].mxu0  ;;  %v247_v7 = vmax.f32 %v223_v2, 0.0 }
 0x122   :  { %v248_v8 = vmax.f32 %v226_v5, 0.0 }
 0x124   :  { %v256_v9 = vpack.c.bf16 %v248_v8, %v247_v7 }
 0x125   :  { %v230_v10 = vpop.f32.mrb[24].mxu0 }
 0x126   :  { %v231_v11 = vadd.f32 %v660_v18, %v230_v10  ;;  %v503_v12 = vpop.f32.mrb[25].mxu0  ;;  %528 = vmatmul.mubr.msk.bf16.gmra.mrb[20].mxu1 %vm266_vm2, %v256_v9 }
 0x127   :  { %v233_v13 = vpop.f32.mrb[26].mxu0  ;;  %531 = vmatprep.mubr.msk.bf16.mxu1 %vm553_vm0, %v552_v0 }
 0x128   :  { %v234_v14 = vadd.f32 %v660_v18, %v233_v13  ;;  %v504_v15 = vpop.f32.mrb[27].mxu0  ;;  %v249_v16 = vmax.f32 %v231_v11, 0.0 }
 0x12a   :  { %v250_v17 = vmax.f32 %v234_v14, 0.0 }
 0x12c   :  { %v257_v19 = vpack.c.bf16 %v250_v17, %v249_v16 }
 0x12e   :  { %532 = vmatmul.mubr.msk.bf16.gmra.mrb[24].mxu1 %vm266_vm2, %v257_v19 }
 0x1d1   :  { %v326_v21 = vpop.f32.mrb[0].mxu1 }
 0x1d2   :  { %v327_v22 = vadd.f32 %v698_v20, %v326_v21  ;;  %v509_v23 = vpop.f32.mrb[1].mxu1 }
 0x1d3   :  { %v329_v24 = vpop.f32.mrb[2].mxu1 }
 0x1d4   :  { %v381_v0 = vmax.f32 %v327_v22, 0.0  ;;  %v330_v18 = vadd.f32 %v698_v20, %v329_v24  ;;  %v510_v25 = vpop.f32.mrb[3].mxu1 }
 0x1d6   :  { %396 = vst.msk [vmem:[%s775_s5] sm:$0xff] %vm395_vm3, %v381_v0  ;;  %v382_v26 = vmax.f32 %v330_v18, 0.0 }
 0x1d8   :  { %397 = vst.msk [vmem:[%s775_s5 + $0x8] sm:$0xff] %vm395_vm3, %v382_v26 }
 0x1d9   :  { %v334_v27 = vpop.f32.mrb[4].mxu1 }
 0x1da   :  { %v335_v28 = vadd.f32 %v698_v20, %v334_v27  ;;  %v513_v29 = vpop.f32.mrb[5].mxu1 }
 0x1db   :  { %v337_v30 = vpop.f32.mrb[6].mxu1 }
 0x1dc   :  { %v383_v31 = vmax.f32 %v335_v28, 0.0  ;;  %v338_v32 = vadd.f32 %v698_v20, %v337_v30  ;;  %v514_v33 = vpop.f32.mrb[7].mxu1 }
 0x1de   :  { %398 = vst.msk [vmem:[%s775_s5 + $0x10] sm:$0xff] %vm395_vm3, %v383_v31  ;;  %v384_v34 = vmax.f32 %v338_v32, 0.0 }
 0x1e0   :  { %399 = vst.msk [vmem:[%s775_s5 + $0x18] sm:$0xff] %vm395_vm3, %v384_v34 }
 0x1e1   :  { %v342_v35 = vpop.f32.mrb[8].mxu1 }
 0x1e2   :  { %v343_v36 = vadd.f32 %v698_v20, %v342_v35  ;;  %v517_v37 = vpop.f32.mrb[9].mxu1 }
 0x1e3   :  { %v345_v38 = vpop.f32.mrb[10].mxu1 }
 0x1e4   :  { %v385_v39 = vmax.f32 %v343_v36, 0.0  ;;  %v346_v40 = vadd.f32 %v698_v20, %v345_v38  ;;  %v518_v41 = vpop.f32.mrb[11].mxu1 }
 0x1e6   :  { %400 = vst.msk [vmem:[%s775_s5 + $0x20] sm:$0xff] %vm395_vm3, %v385_v39  ;;  %v386_v42 = vmax.f32 %v346_v40, 0.0 }
 0x1e8   :  { %401 = vst.msk [vmem:[%s775_s5 + $0x28] sm:$0xff] %vm395_vm3, %v386_v42 }
 0x1e9   :  { %v350_v43 = vpop.f32.mrb[12].mxu1 }
 0x1ea   :  { %v351_v44 = vadd.f32 %v698_v20, %v350_v43  ;;  %v521_v45 = vpop.f32.mrb[13].mxu1 }
 0x1eb   :  { %v353_v46 = vpop.f32.mrb[14].mxu1 }
 0x1ec   :  { %v387_v47 = vmax.f32 %v351_v44, 0.0  ;;  %v354_v48 = vadd.f32 %v698_v20, %v353_v46  ;;  %v522_v49 = vpop.f32.mrb[15].mxu1 }
 0x1ee   :  { %402 = vst.msk [vmem:[%s775_s5 + $0x30] sm:$0xff] %vm395_vm3, %v387_v47  ;;  %v388_v50 = vmax.f32 %v354_v48, 0.0 }
 0x1f0   :  { %403 = vst.msk [vmem:[%s775_s5 + $0x38] sm:$0xff] %vm395_vm3, %v388_v50 }
 0x1f1   :  { %v358_v51 = vpop.f32.mrb[16].mxu1 }
 0x1f2   :  { %v359_v52 = vadd.f32 %v698_v20, %v358_v51  ;;  %v525_v53 = vpop.f32.mrb[17].mxu1 }
 0x1f3   :  { %v361_v54 = vpop.f32.mrb[18].mxu1 }
 0x1f4   :  { %v389_v55 = vmax.f32 %v359_v52, 0.0  ;;  %v362_v56 = vadd.f32 %v698_v20, %v361_v54  ;;  %v526_v57 = vpop.f32.mrb[19].mxu1 }
 0x1f6   :  { %404 = vst.msk [vmem:[%s775_s5 + $0x40] sm:$0xff] %vm395_vm3, %v389_v55  ;;  %v390_v58 = vmax.f32 %v362_v56, 0.0 }
 0x1f8   :  { %405 = vst.msk [vmem:[%s775_s5 + $0x48] sm:$0xff] %vm395_vm3, %v390_v58 }
 0x1f9   :  { %v366_v59 = vpop.f32.mrb[20].mxu1 }
 0x1fa   :  { %v367_v60 = vadd.f32 %v698_v20, %v366_v59  ;;  %v529_v61 = vpop.f32.mrb[21].mxu1 }
 0x1fb   :  { %v369_v62 = vpop.f32.mrb[22].mxu1 }
 0x1fc   :  { %v391_v63 = vmax.f32 %v367_v60, 0.0  ;;  %v370_v1 = vadd.f32 %v698_v20, %v369_v62  ;;  %v530_v2 = vpop.f32.mrb[23].mxu1 }
 0x1fe   :  { %406 = vst.msk [vmem:[%s775_s5 + $0x50] sm:$0xff] %vm395_vm3, %v391_v63  ;;  %v392_v3 = vmax.f32 %v370_v1, 0.0 }
 0x200   :  { %407 = vst.msk [vmem:[%s775_s5 + $0x58] sm:$0xff] %vm395_vm3, %v392_v3 }
 0x201   :  { %v374_v4 = vpop.f32.mrb[24].mxu1 }
 0x202   :  { %v375_v5 = vadd.f32 %v698_v20, %v374_v4  ;;  %v533_v6 = vpop.f32.mrb[25].mxu1 }
 0x203   :  { %v377_v7 = vpop.f32.mrb[26].mxu1 }
 0x204   :  { %v393_v8 = vmax.f32 %v375_v5, 0.0  ;;  %v378_v9 = vadd.f32 %v698_v20, %v377_v7  ;;  %v534_v10 = vpop.f32.mrb[27].mxu1 }
 0x206   :  { %408 = vst.msk [vmem:[%s775_s5 + $0x60] sm:$0xff] %vm395_vm3, %v393_v8  ;;  %v394_v11 = vmax.f32 %v378_v9, 0.0 }
 0x208   :  { %409 = vst.msk [vmem:[%s775_s5 + $0x68] sm:$0xff] %vm395_vm3, %v394_v11 }

// kernel: tile.13
= control target key start
LH: loop header
LB: loop body
LE: loop exit
PB: predicated region body
PF: predicated region fallthrough
CT: control target
= control target key end

     0   :  { %s22_s0 = inlined_call_operand.vmem [shape: f32[8], index: 0, kind: input, shape index: {}]   ;;  %s23_s1 = inlined_call_operand.vmem [shape: f32[4,8], index: 1, kind: output, shape index: {}]  }
   0x1   :  { %v4_v0 = vld [vmem:[%s22_s0] ss:$0 sm:$0xff] }
   0x2   :  { %5 = vst [vmem:[%s23_s1] sm:$0xf] %v4_v0 }

// kernel: tile.14
= control target key start
LH: loop header
LB: loop body
LE: loop exit
PB: predicated region body
PF: predicated region fallthrough
CT: control target
= control target key end

     0   :  { %vm7_vm0 = vcmask 64512   ;;  %s37_s8 = smov 8   ;;  %s38_s9 = smov 16   ;;  %vm13_vm1 = vcmask 261312   ;;  %vm19_vm2 = vcmask 195712   ;;  %vm25_vm3 = vcmask 130112   ;;  %s55_s0 = inlined_call_operand.vmem [shape: f32[4,8], index: 0, kind: input, shape index: {}]   ;;  %s56_s1 = inlined_call_operand.vmem [shape: f32[1,32], index: 1, kind: output, shape index: {}]  }
   0x1   :  { %v4_v0 = vld [vmem:[%s55_s0] sm:$0xf]  ;;  %s36_s0 = smov 24  }
   0x2   :  { %5 = vst [vmem:[#allocation1] sm:$0xf] %v4_v0 }
   0x9   :  { %v10_v1 = vld [vmem:[#allocation1 + $0x3] sm:$0x1]   ;;  %v22_v2 = vld [vmem:[#allocation1 + $0x1] sm:$0x1]   ;;  %v6_v3 = vld [vmem:[#allocation1] sm:$0x1]  }
   0xa   :  { %11 = vrot.lane.b32.xlu0 %v10_v1, %s36_s0  ;;  %23 = vrot.lane.b32.xlu1 %v22_v2, %s37_s8  ;;  %v16_v4 = vld [vmem:[#allocation1 + $0x2] sm:$0x1]   ;;  %8 = vst.msk [vmem:[#allocation0] sm:$0x1] %vm7_vm0, %v6_v3  }
   0xe   :  { %17 = vrot.lane.b32.xlu0 %v16_v4, %s38_s9 }
  0x7c   :  { %v12_v5 = vpop.permute.xlu0 %11   ;;  %v24_v6 = vpop.permute.xlu1 %23  }
  0x7d   :  { %14 = vst.msk [vmem:[#allocation0] sm:$0x1] %vm13_vm1, %v12_v5  }
  0x80   :  { %v18_v7 = vpop.permute.xlu0 %17  }
  0x81   :  { %20 = vst.msk [vmem:[#allocation0] sm:$0x1] %vm19_vm2, %v18_v7  }
  0x82   :  { %26 = vst.msk [vmem:[#allocation0] sm:$0x1] %vm25_vm3, %v24_v6  }
  0x89   :  { %v30_v8 = vld [vmem:[#allocation0] sm:$0x1] }
  0x8a   :  { %32 = vst [vmem:[%s56_s1] sm:$0x1] %v30_v8 }

// kernel: autoencoder_forward.4
= control target key start
LH: loop header
LB: loop body
LE: loop exit
PB: predicated region body
PF: predicated region fallthrough
CT: control target
= control target key end

     0   :  { %vm110_vm0 = vcmask 523264   ;;  %vm248_vm1 = vcmask 261120   ;;  %s477_s1 = inlined_call_operand.vmem [shape: bf16[64,32], index: 1, kind: input, shape index: {}]   ;;  %s478_s0 = inlined_call_operand.vmem [shape: bf16[128,64], index: 0, kind: input, shape index: {}]   ;;  %s479_s2 = inlined_call_operand.vmem [shape: f32[1,32], index: 2, kind: input, shape index: {}]   ;;  %s480_s3 = inlined_call_operand.vmem [shape: f32[128,32], index: 3, kind: output, shape index: {}]  }
   0x1   :  { %v334_v0 = vld [vmem:[%s477_s1] sm:$0xff]   ;;  %v335_v1 = vld [vmem:[%s477_s1 + $0x8] sm:$0xff]   ;;  %v336_v2 = vld [vmem:[%s477_s1 + $0x10] sm:$0xff]  }
   0x2   :  { %302 = vmatprep.subr.bf16.mxu0 %v334_v0  ;;  %326 = vmatprep.subr.bf16.mxu1 %v334_v0  ;;  %v338_v3 = vld [vmem:[%s478_s0] sm:$0xff]   ;;  %v337_v5 = vld [vmem:[%s477_s1 + $0x18] sm:$0xff]   ;;  %v340_v6 = vld [vmem:[%s478_s0 + $0x8] sm:$0xff]  }
   0x3   :  { %303 = vmatpush3.bf16.msra.mxu0 %v334_v0  ;;  %330 = vmatpush3.bf16.msra.mxu1 %v334_v0  ;;  %v339_v4 = vld [vmem:[%s478_s0 + $0x20] sm:$0xff]   ;;  %v341_v7 = vld [vmem:[%s478_s0 + $0x28] sm:$0xff]   ;;  %v342_v8 = vld [vmem:[%s478_s0 + $0x10] sm:$0xff]  }
   0x4   :  { %304 = vmatprep.subr.bf16.mxu0 %v335_v1  ;;  %327 = vmatprep.subr.bf16.mxu1 %v335_v1  ;;  %v343_v9 = vld [vmem:[%s478_s0 + $0x30] sm:$0xff]   ;;  %v344_v10 = vld [vmem:[%s478_s0 + $0x18] sm:$0xff]   ;;  %v269_v12 = vld [vmem:[%s479_s2] ss:$0 sm:$0xff] }
   0x5   :  { %310 = vmatprep.mubr.msk.bf16.mxu0 %vm110_vm0, %v338_v3  ;;  %318 = vmatprep.mubr.msk.bf16.mxu1 %vm110_vm0, %v339_v4  ;;  %v345_v11 = vld [vmem:[%s478_s0 + $0x38] sm:$0xff]  }
   0x7   :  { %305 = vmatpush3.bf16.msra.mxu0 %v335_v1  ;;  %331 = vmatpush3.bf16.msra.mxu1 %v335_v1 }
   0x8   :  { %306 = vmatprep.subr.bf16.mxu0 %v336_v2  ;;  %328 = vmatprep.subr.bf16.mxu1 %v336_v2 }
   0xb   :  { %307 = vmatpush3.bf16.msra.mxu0 %v336_v2  ;;  %332 = vmatpush3.bf16.msra.mxu1 %v336_v2 }
   0xc   :  { %308 = vmatprep.subr.bf16.mxu0 %v337_v5  ;;  %329 = vmatprep.subr.bf16.mxu1 %v337_v5 }
   0xf   :  { %309 = vmatpush3.bf16.msra.mxu0 %v337_v5  ;;  %333 = vmatpush3.bf16.msra.mxu1 %v337_v5 }
  0x12   :  { %311 = vmatmul.mubr.msk.bf16.vlgmr.msra.gmra.mrb[0].mxu0 %vm110_vm0, %v340_v6  ;;  %319 = vmatmul.mubr.msk.bf16.vlgmr.msra.gmra.mrb[0].mxu1 %vm110_vm0, %v341_v7 }
  0x13   :  { %314 = vmatprep.mubr.msk.bf16.mxu0 %vm110_vm0, %v342_v8  ;;  %322 = vmatprep.mubr.msk.bf16.mxu1 %vm110_vm0, %v343_v9 }
  0x1a   :  { %315 = vmatmul.mubr.msk.bf16.gmra.mrb[4].mxu0 %vm110_vm0, %v344_v10  ;;  %323 = vmatmul.mubr.msk.bf16.gmra.mrb[4].mxu1 %vm110_vm0, %v345_v11 }
  0xe5   :  { %v312_v13 = vpop.f32.mrb[0].mxu0  ;;  %v320_v14 = vpop.f32.mrb[0].mxu1 }
  0xe6   :  { %v178_v15 = vadd.f32 %v312_v13, %v269_v12  ;;  %v210_v16 = vadd.f32 %v320_v14, %v269_v12  ;;  %v169_v17 = vpop.f32.mrb[1].mxu0  ;;  %v201_v18 = vpop.f32.mrb[1].mxu1 }
  0xe7   :  { %v170_v19 = vadd.f32 %v269_v12, %v169_v17  ;;  %v202_v20 = vadd.f32 %v269_v12, %v201_v18  ;;  %v313_v21 = vpop.f32.mrb[2].mxu0  ;;  %v321_v22 = vpop.f32.mrb[2].mxu1 }
  0xe8   :  { %v234_v23 = vmax.f32 %v178_v15, 0.0  ;;  %v242_v24 = vmax.f32 %v210_v16, 0.0  ;;  %v181_v25 = vadd.f32 %v313_v21, %v269_v12  ;;  %v213_v26 = vadd.f32 %v321_v22, %v269_v12  ;;  %v172_v27 = vpop.f32.mrb[3].mxu0  ;;  %v204_v28 = vpop.f32.mrb[3].mxu1 }
  0xe9   :  { %v232_v29 = vmax.f32 %v170_v19, 0.0  ;;  %v240_v30 = vmax.f32 %v202_v20, 0.0  ;;  %v173_v31 = vadd.f32 %v269_v12, %v172_v27  ;;  %v205_v32 = vadd.f32 %v269_v12, %v204_v28 }
  0xea   :  { %251 = vst.msk [vmem:[%s480_s3 + $0x10] sm:$0xff] %vm248_vm1, %v234_v23  ;;  %259 = vst.msk [vmem:[%s480_s3 + $0x50] sm:$0xff] %vm248_vm1, %v242_v24  ;;  %v235_v33 = vmax.f32 %v181_v25, 0.0  ;;  %v243_v34 = vmax.f32 %v213_v26, 0.0 }
  0xeb   :  { %249 = vst.msk [vmem:[%s480_s3] sm:$0xff] %vm248_vm1, %v232_v29  ;;  %257 = vst.msk [vmem:[%s480_s3 + $0x40] sm:$0xff] %vm248_vm1, %v240_v30  ;;  %v233_v35 = vmax.f32 %v173_v31, 0.0  ;;  %v241_v36 = vmax.f32 %v205_v32, 0.0 }
  0xec   :  { %252 = vst.msk [vmem:[%s480_s3 + $0x18] sm:$0xff] %vm248_vm1, %v235_v33  ;;  %260 = vst.msk [vmem:[%s480_s3 + $0x58] sm:$0xff] %vm248_vm1, %v243_v34 }
  0xed   :  { %250 = vst.msk [vmem:[%s480_s3 + $0x8] sm:$0xff] %vm248_vm1, %v233_v35  ;;  %258 = vst.msk [vmem:[%s480_s3 + $0x48] sm:$0xff] %vm248_vm1, %v241_v36  ;;  %v316_v37 = vpop.f32.mrb[4].mxu0  ;;  %v324_v38 = vpop.f32.mrb[4].mxu1 }
  0xee   :  { %v194_v39 = vadd.f32 %v316_v37, %v269_v12  ;;  %v226_v40 = vadd.f32 %v324_v38, %v269_v12  ;;  %v185_v41 = vpop.f32.mrb[5].mxu0  ;;  %v217_v42 = vpop.f32.mrb[5].mxu1 }
  0xef   :  { %v186_v43 = vadd.f32 %v269_v12, %v185_v41  ;;  %v218_v44 = vadd.f32 %v269_v12, %v217_v42  ;;  %v317_v45 = vpop.f32.mrb[6].mxu0  ;;  %v325_v46 = vpop.f32.mrb[6].mxu1 }
  0xf0   :  { %v238_v47 = vmax.f32 %v194_v39, 0.0  ;;  %v246_v48 = vmax.f32 %v226_v40, 0.0  ;;  %v197_v49 = vadd.f32 %v317_v45, %v269_v12  ;;  %v229_v50 = vadd.f32 %v325_v46, %v269_v12  ;;  %v188_v51 = vpop.f32.mrb[7].mxu0  ;;  %v220_v52 = vpop.f32.mrb[7].mxu1 }
  0xf1   :  { %v236_v53 = vmax.f32 %v186_v43, 0.0  ;;  %v244_v54 = vmax.f32 %v218_v44, 0.0  ;;  %v189_v55 = vadd.f32 %v269_v12, %v188_v51  ;;  %v221_v56 = vadd.f32 %v269_v12, %v220_v52 }
  0xf2   :  { %255 = vst.msk [vmem:[%s480_s3 + $0x30] sm:$0xff] %vm248_vm1, %v238_v47  ;;  %263 = vst.msk [vmem:[%s480_s3 + $0x70] sm:$0xff] %vm248_vm1, %v246_v48  ;;  %v239_v57 = vmax.f32 %v197_v49, 0.0  ;;  %v247_v58 = vmax.f32 %v229_v50, 0.0 }
  0xf3   :  { %253 = vst.msk [vmem:[%s480_s3 + $0x20] sm:$0xff] %vm248_vm1, %v236_v53  ;;  %261 = vst.msk [vmem:[%s480_s3 + $0x60] sm:$0xff] %vm248_vm1, %v244_v54  ;;  %v237_v59 = vmax.f32 %v189_v55, 0.0  ;;  %v245_v60 = vmax.f32 %v221_v56, 0.0 }
  0xf4   :  { %256 = vst.msk [vmem:[%s480_s3 + $0x38] sm:$0xff] %vm248_vm1, %v239_v57  ;;  %264 = vst.msk [vmem:[%s480_s3 + $0x78] sm:$0xff] %vm248_vm1, %v247_v58 }
  0xf5   :  { %254 = vst.msk [vmem:[%s480_s3 + $0x28] sm:$0xff] %vm248_vm1, %v237_v59  ;;  %262 = vst.msk [vmem:[%s480_s3 + $0x68] sm:$0xff] %vm248_vm1, %v245_v60 }

// kernel: tile.18
= control target key start
LH: loop header
LB: loop body
LE: loop exit
PB: predicated region body
PF: predicated region fallthrough
CT: control target
= control target key end

     0   :  { %s22_s0 = inlined_call_operand.vmem [shape: f32[2], index: 0, kind: input, shape index: {}]   ;;  %s23_s1 = inlined_call_operand.vmem [shape: f32[4,2], index: 1, kind: output, shape index: {}]  }
   0x1   :  { %v4_v0 = vld [vmem:[%s22_s0] ss:$0 sm:$0xff] }
   0x2   :  { %5 = vst [vmem:[%s23_s1] sm:$0xf] %v4_v0 }

// kernel: tile.19
= control target key start
LH: loop header
LB: loop body
LE: loop exit
PB: predicated region body
PF: predicated region fallthrough
CT: control target
= control target key end

     0   :  { %vm7_vm0 = vcmask 15360   ;;  %s37_s8 = smov 2   ;;  %s38_s9 = smov 4   ;;  %vm13_vm1 = vcmask 64560   ;;  %vm19_vm2 = vcmask 48160   ;;  %vm25_vm3 = vcmask 31760   ;;  %s55_s0 = inlined_call_operand.vmem [shape: f32[4,2], index: 0, kind: input, shape index: {}]   ;;  %s56_s1 = inlined_call_operand.vmem [shape: f32[1,8], index: 1, kind: output, shape index: {}]  }
   0x1   :  { %v4_v0 = vld [vmem:[%s55_s0] sm:$0xf]  ;;  %s36_s0 = smov 6  }
   0x2   :  { %5 = vst [vmem:[#allocation1] sm:$0xf] %v4_v0 }
   0x9   :  { %v10_v1 = vld [vmem:[#allocation1 + $0x3] sm:$0x1]   ;;  %v22_v2 = vld [vmem:[#allocation1 + $0x1] sm:$0x1]   ;;  %v6_v3 = vld [vmem:[#allocation1] sm:$0x1]  }
   0xa   :  { %11 = vrot.lane.b32.xlu0 %v10_v1, %s36_s0  ;;  %23 = vrot.lane.b32.xlu1 %v22_v2, %s37_s8  ;;  %v16_v4 = vld [vmem:[#allocation1 + $0x2] sm:$0x1]   ;;  %8 = vst.msk [vmem:[#allocation0] sm:$0x1] %vm7_vm0, %v6_v3  }
   0xe   :  { %17 = vrot.lane.b32.xlu0 %v16_v4, %s38_s9 }
  0x7c   :  { %v12_v5 = vpop.permute.xlu0 %11   ;;  %v24_v6 = vpop.permute.xlu1 %23  }
  0x7d   :  { %14 = vst.msk [vmem:[#allocation0] sm:$0x1] %vm13_vm1, %v12_v5  }
  0x80   :  { %v18_v7 = vpop.permute.xlu0 %17  }
  0x81   :  { %20 = vst.msk [vmem:[#allocation0] sm:$0x1] %vm19_vm2, %v18_v7  }
  0x82   :  { %26 = vst.msk [vmem:[#allocation0] sm:$0x1] %vm25_vm3, %v24_v6  }
  0x89   :  { %v30_v8 = vld [vmem:[#allocation0] sm:$0x1] }
  0x8a   :  { %32 = vst [vmem:[%s56_s1] sm:$0x1] %v30_v8 }

// kernel: autoencoder_forward.5
= control target key start
LH: loop header
LB: loop body
LE: loop exit
PB: predicated region body
PF: predicated region fallthrough
CT: control target
= control target key end

     0   :  { %vm262_vm0 = vcmask 261120   ;;  %vm712_vm1 = vcmask 64512   ;;  %s1595_s1 = inlined_call_operand.vmem [shape: bf16[32,8], index: 1, kind: input, shape index: {}]   ;;  %s1596_s0 = inlined_call_operand.vmem [shape: bf16[512,32], index: 0, kind: input, shape index: {}]   ;;  %s1597_s2 = inlined_call_operand.vmem [shape: f32[1,8], index: 2, kind: input, shape index: {}]   ;;  %s1598_s3 = inlined_call_operand.vmem [shape: f32[512,8], index: 3, kind: output, shape index: {}]  }
   0x1   :  { %v954_v0 = vld [vmem:[%s1595_s1] sm:$0xff]   ;;  %v955_v1 = vld [vmem:[%s1595_s1 + $0x8] sm:$0xff]   ;;  %v960_v6 = vld [vmem:[%s1596_s0 + $0x10] sm:$0xff]  }
   0x2   :  { %882 = vmatprep.subr.bf16.mxu0 %v954_v0  ;;  %950 = vmatprep.subr.bf16.mxu1 %v954_v0  ;;  %v956_v2 = vld [vmem:[%s1596_s0] sm:$0xff]   ;;  %v958_v4 = vld [vmem:[%s1596_s0 + $0x8] sm:$0xff]   ;;  %v961_v7 = vld [vmem:[%s1596_s0 + $0x90] sm:$0xff]  }
   0x3   :  { %883 = vmatpush3.bf16.msra.mxu0 %v954_v0  ;;  %952 = vmatpush3.bf16.msra.mxu1 %v954_v0  ;;  %v957_v3 = vld [vmem:[%s1596_s0 + $0x80] sm:$0xff]   ;;  %v959_v5 = vld [vmem:[%s1596_s0 + $0x88] sm:$0xff]   ;;  %v962_v8 = vld [vmem:[%s1596_s0 + $0x18] sm:$0xff]  }
   0x4   :  { %884 = vmatprep.subr.bf16.mxu0 %v955_v1  ;;  %951 = vmatprep.subr.bf16.mxu1 %v955_v1  ;;  %v963_v9 = vld [vmem:[%s1596_s0 + $0x98] sm:$0xff]   ;;  %v964_v10 = vld [vmem:[%s1596_s0 + $0x20] sm:$0xff]   ;;  %v966_v12 = vld [vmem:[%s1596_s0 + $0x28] sm:$0xff]  }
   0x5   :  { %886 = vmatprep.mubr.msk.bf16.mxu0 %vm262_vm0, %v956_v2  ;;  %918 = vmatprep.mubr.msk.bf16.mxu1 %vm262_vm0, %v957_v3  ;;  %v965_v11 = vld [vmem:[%s1596_s0 + $0xa0] sm:$0xff]   ;;  %v967_v13 = vld [vmem:[%s1596_s0 + $0xa8] sm:$0xff]   ;;  %v968_v14 = vld [vmem:[%s1596_s0 + $0x30] sm:$0xff]  }
   0x6   :  { %v969_v15 = vld [vmem:[%s1596_s0 + $0xb0] sm:$0xff]   ;;  %v970_v16 = vld [vmem:[%s1596_s0 + $0x38] sm:$0xff]   ;;  %v972_v18 = vld [vmem:[%s1596_s0 + $0x40] sm:$0xff]  }
   0x7   :  { %885 = vmatpush3.bf16.msra.mxu0 %v955_v1  ;;  %953 = vmatpush3.bf16.msra.mxu1 %v955_v1  ;;  %v971_v17 = vld [vmem:[%s1596_s0 + $0xb8] sm:$0xff]   ;;  %v973_v19 = vld [vmem:[%s1596_s0 + $0xc0] sm:$0xff]   ;;  %v974_v20 = vld [vmem:[%s1596_s0 + $0x48] sm:$0xff]  }
   0x8   :  { %v975_v21 = vld [vmem:[%s1596_s0 + $0xc8] sm:$0xff]   ;;  %v976_v22 = vld [vmem:[%s1596_s0 + $0x50] sm:$0xff]   ;;  %v978_v24 = vld [vmem:[%s1596_s0 + $0x58] sm:$0xff]  }
   0x9   :  { %v977_v23 = vld [vmem:[%s1596_s0 + $0xd0] sm:$0xff]   ;;  %v979_v25 = vld [vmem:[%s1596_s0 + $0xd8] sm:$0xff]   ;;  %v980_v26 = vld [vmem:[%s1596_s0 + $0x60] sm:$0xff]  }
   0xa   :  { %887 = vmatmul.mubr.msk.bf16.vlgmr.msra.gmra.mrb[0].mxu0 %vm262_vm0, %v958_v4  ;;  %919 = vmatmul.mubr.msk.bf16.vlgmr.msra.gmra.mrb[0].mxu1 %vm262_vm0, %v959_v5  ;;  %v981_v27 = vld [vmem:[%s1596_s0 + $0xe0] sm:$0xff]   ;;  %v982_v28 = vld [vmem:[%s1596_s0 + $0x68] sm:$0xff]   ;;  %v984_v30 = vld [vmem:[%s1596_s0 + $0x70] sm:$0xff]  }
   0xb   :  { %890 = vmatprep.mubr.msk.bf16.mxu0 %vm262_vm0, %v960_v6  ;;  %922 = vmatprep.mubr.msk.bf16.mxu1 %vm262_vm0, %v961_v7  ;;  %v983_v29 = vld [vmem:[%s1596_s0 + $0xe8] sm:$0xff]   ;;  %v985_v31 = vld [vmem:[%s1596_s0 + $0xf0] sm:$0xff]   ;;  %v986_v32 = vld [vmem:[%s1596_s0 + $0x78] sm:$0xff]  }
   0xc   :  { %v987_v33 = vld [vmem:[%s1596_s0 + $0xf8] sm:$0xff]   ;;  %v1273_v34 = vld [vmem:[%s1597_s2] ss:$0 sm:$0xff] }
  0x12   :  { %891 = vmatmul.mubr.msk.bf16.gmra.mrb[4].mxu0 %vm262_vm0, %v962_v8  ;;  %923 = vmatmul.mubr.msk.bf16.gmra.mrb[4].mxu1 %vm262_vm0, %v963_v9 }
  0x13   :  { %894 = vmatprep.mubr.msk.bf16.mxu0 %vm262_vm0, %v964_v10  ;;  %926 = vmatprep.mubr.msk.bf16.mxu1 %vm262_vm0, %v965_v11 }
  0x1a   :  { %895 = vmatmul.mubr.msk.bf16.gmra.mrb[8].mxu0 %vm262_vm0, %v966_v12  ;;  %927 = vmatmul.mubr.msk.bf16.gmra.mrb[8].mxu1 %vm262_vm0, %v967_v13 }
  0x1b   :  { %898 = vmatprep.mubr.msk.bf16.mxu0 %vm262_vm0, %v968_v14  ;;  %930 = vmatprep.mubr.msk.bf16.mxu1 %vm262_vm0, %v969_v15 }
  0x22   :  { %899 = vmatmul.mubr.msk.bf16.gmra.mrb[12].mxu0 %vm262_vm0, %v970_v16  ;;  %931 = vmatmul.mubr.msk.bf16.gmra.mrb[12].mxu1 %vm262_vm0, %v971_v17 }
  0x23   :  { %902 = vmatprep.mubr.msk.bf16.mxu0 %vm262_vm0, %v972_v18  ;;  %934 = vmatprep.mubr.msk.bf16.mxu1 %vm262_vm0, %v973_v19 }
  0x2a   :  { %903 = vmatmul.mubr.msk.bf16.gmra.mrb[16].mxu0 %vm262_vm0, %v974_v20  ;;  %935 = vmatmul.mubr.msk.bf16.gmra.mrb[16].mxu1 %vm262_vm0, %v975_v21 }
  0x2b   :  { %906 = vmatprep.mubr.msk.bf16.mxu0 %vm262_vm0, %v976_v22  ;;  %938 = vmatprep.mubr.msk.bf16.mxu1 %vm262_vm0, %v977_v23 }
  0x32   :  { %907 = vmatmul.mubr.msk.bf16.gmra.mrb[20].mxu0 %vm262_vm0, %v978_v24  ;;  %939 = vmatmul.mubr.msk.bf16.gmra.mrb[20].mxu1 %vm262_vm0, %v979_v25 }
  0x33   :  { %910 = vmatprep.mubr.msk.bf16.mxu0 %vm262_vm0, %v980_v26  ;;  %942 = vmatprep.mubr.msk.bf16.mxu1 %vm262_vm0, %v981_v27 }
  0x3a   :  { %911 = vmatmul.mubr.msk.bf16.gmra.mrb[24].mxu0 %vm262_vm0, %v982_v28  ;;  %943 = vmatmul.mubr.msk.bf16.gmra.mrb[24].mxu1 %vm262_vm0, %v983_v29 }
  0x3b   :  { %914 = vmatprep.mubr.msk.bf16.mxu0 %vm262_vm0, %v984_v30  ;;  %946 = vmatprep.mubr.msk.bf16.mxu1 %vm262_vm0, %v985_v31 }
  0x42   :  { %915 = vmatmul.mubr.msk.bf16.gmra.mrb[28].mxu0 %vm262_vm0, %v986_v32  ;;  %947 = vmatmul.mubr.msk.bf16.gmra.mrb[28].mxu1 %vm262_vm0, %v987_v33 }
  0xdd   :  { %v888_v35 = vpop.f32.mrb[0].mxu0  ;;  %v920_v36 = vpop.f32.mrb[0].mxu1 }
  0xde   :  { %v402_v37 = vadd.f32 %v888_v35, %v1273_v34  ;;  %v530_v38 = vadd.f32 %v920_v36, %v1273_v34  ;;  %v393_v39 = vpop.f32.mrb[1].mxu0  ;;  %v521_v40 = vpop.f32.mrb[1].mxu1 }
  0xdf   :  { %v394_v41 = vadd.f32 %v1273_v34, %v393_v39  ;;  %v522_v42 = vadd.f32 %v1273_v34, %v521_v40  ;;  %v889_v43 = vpop.f32.mrb[2].mxu0  ;;  %v921_v44 = vpop.f32.mrb[2].mxu1 }
  0xe0   :  { %988 = vtanh.f32 %v402_v37  ;;  %v405_v45 = vadd.f32 %v889_v43, %v1273_v34  ;;  %v396_v46 = vpop.f32.mrb[3].mxu0  ;;  %v524_v47 = vpop.f32.mrb[3].mxu1  ;;  %v533_v48 = vadd.f32 %v921_v44, %v1273_v34 }
  0xe1   :  { %990 = vtanh.f32 %v530_v38  ;;  %v397_v49 = vadd.f32 %v1273_v34, %v396_v46  ;;  %v525_v50 = vadd.f32 %v1273_v34, %v524_v47 }
  0xe2   :  { %992 = vtanh.f32 %v394_v41 }
  0xe3   :  { %994 = vtanh.f32 %v522_v42 }
  0xe4   :  { %996 = vtanh.f32 %v405_v45 }
  0xe5   :  { %998 = vtanh.f32 %v533_v48  ;;  %v892_v51 = vpop.f32.mrb[4].mxu0  ;;  %v924_v52 = vpop.f32.mrb[4].mxu1 }
  0xe6   :  { %1000 = vtanh.f32 %v397_v49  ;;  %v418_v53 = vadd.f32 %v892_v51, %v1273_v34  ;;  %v546_v54 = vadd.f32 %v924_v52, %v1273_v34  ;;  %v409_v55 = vpop.f32.mrb[5].mxu0  ;;  %v537_v56 = vpop.f32.mrb[5].mxu1 }
  0xe7   :  { %1002 = vtanh.f32 %v525_v50  ;;  %v410_v57 = vadd.f32 %v1273_v34, %v409_v55  ;;  %v538_v58 = vadd.f32 %v1273_v34, %v537_v56  ;;  %v893_v59 = vpop.f32.mrb[6].mxu0  ;;  %v925_v60 = vpop.f32.mrb[6].mxu1 }
  0xe8   :  { %1004 = vtanh.f32 %v418_v53  ;;  %v421_v61 = vadd.f32 %v893_v59, %v1273_v34  ;;  %v412_v62 = vpop.f32.mrb[7].mxu0  ;;  %v540_v63 = vpop.f32.mrb[7].mxu1  ;;  %v549_v0 = vadd.f32 %v925_v60, %v1273_v34 }
  0xe9   :  { %1006 = vtanh.f32 %v546_v54  ;;  %v413_v2 = vadd.f32 %v1273_v34, %v412_v62  ;;  %v541_v4 = vadd.f32 %v1273_v34, %v540_v63 }
  0xea   :  { %v989_v1 = vpop.eup %988  ;;  %1008 = vtanh.f32 %v410_v57 }
  0xeb   :  { %v991_v3 = vpop.eup %990  ;;  %715 = vst.msk [vmem:[%s1598_s3 + $0x10] sm:$0xff] %vm712_vm1, %v989_v1  ;;  %1010 = vtanh.f32 %v538_v58 }
  0xec   :  { %v993_v5 = vpop.eup %992  ;;  %747 = vst.msk [vmem:[%s1598_s3 + $0x110] sm:$0xff] %vm712_vm1, %v991_v3  ;;  %1012 = vtanh.f32 %v421_v61 }
  0xed   :  { %v995_v6 = vpop.eup %994  ;;  %713 = vst.msk [vmem:[%s1598_s3] sm:$0xff] %vm712_vm1, %v993_v5  ;;  %1014 = vtanh.f32 %v549_v0  ;;  %v896_v7 = vpop.f32.mrb[8].mxu0 }
  0xee   :  { %v928_v8 = vpop.f32.mrb[8].mxu1  ;;  %v997_v9 = vpop.eup %996  ;;  %745 = vst.msk [vmem:[%s1598_s3 + $0x100] sm:$0xff] %vm712_vm1, %v995_v6  ;;  %1016 = vtanh.f32 %v413_v2  ;;  %v434_v10 = vadd.f32 %v896_v7, %v1273_v34 }
  0xef   :  { %v562_v11 = vadd.f32 %v928_v8, %v1273_v34  ;;  %v425_v12 = vpop.f32.mrb[9].mxu0  ;;  %v553_v13 = vpop.f32.mrb[9].mxu1  ;;  %716 = vst.msk [vmem:[%s1598_s3 + $0x18] sm:$0xff] %vm712_vm1, %v997_v9  ;;  %1018 = vtanh.f32 %v541_v4 }
  0xf0   :  { %v999_v14 = vpop.eup %998  ;;  %v426_v15 = vadd.f32 %v1273_v34, %v425_v12  ;;  %v554_v16 = vadd.f32 %v1273_v34, %v553_v13  ;;  %v897_v17 = vpop.f32.mrb[10].mxu0  ;;  %1020 = vtanh.f32 %v434_v10 }
  0xf1   :  { %v929_v18 = vpop.f32.mrb[10].mxu1  ;;  %v1001_v19 = vpop.eup %1000  ;;  %748 = vst.msk [vmem:[%s1598_s3 + $0x118] sm:$0xff] %vm712_vm1, %v999_v14  ;;  %v437_v20 = vadd.f32 %v897_v17, %v1273_v34  ;;  %1022 = vtanh.f32 %v562_v11 }
  0xf2   :  { %v428_v21 = vpop.f32.mrb[11].mxu0  ;;  %v556_v22 = vpop.f32.mrb[11].mxu1  ;;  %714 = vst.msk [vmem:[%s1598_s3 + $0x8] sm:$0xff] %vm712_vm1, %v1001_v19  ;;  %v565_v24 = vadd.f32 %v929_v18, %v1273_v34  ;;  %1024 = vtanh.f32 %v426_v15 }
  0xf3   :  { %v1003_v23 = vpop.eup %1002  ;;  %v429_v26 = vadd.f32 %v1273_v34, %v428_v21  ;;  %1026 = vtanh.f32 %v554_v16  ;;  %v557_v28 = vadd.f32 %v1273_v34, %v556_v22 }
  0xf4   :  { %v1005_v25 = vpop.eup %1004  ;;  %746 = vst.msk [vmem:[%s1598_s3 + $0x108] sm:$0xff] %vm712_vm1, %v1003_v23  ;;  %1028 = vtanh.f32 %v437_v20 }
  0xf5   :  { %v1007_v27 = vpop.eup %1006  ;;  %719 = vst.msk [vmem:[%s1598_s3 + $0x30] sm:$0xff] %vm712_vm1, %v1005_v25  ;;  %1030 = vtanh.f32 %v565_v24  ;;  %v900_v31 = vpop.f32.mrb[12].mxu0 }
  0xf6   :  { %v1009_v29 = vpop.eup %1008  ;;  %751 = vst.msk [vmem:[%s1598_s3 + $0x130] sm:$0xff] %vm712_vm1, %v1007_v27  ;;  %v932_v32 = vpop.f32.mrb[12].mxu1  ;;  %1032 = vtanh.f32 %v429_v26  ;;  %v450_v35 = vadd.f32 %v900_v31, %v1273_v34 }
  0xf7   :  { %v1011_v30 = vpop.eup %1010  ;;  %717 = vst.msk [vmem:[%s1598_s3 + $0x20] sm:$0xff] %vm712_vm1, %v1009_v29  ;;  %v578_v36 = vadd.f32 %v932_v32, %v1273_v34  ;;  %v441_v37 = vpop.f32.mrb[13].mxu0  ;;  %1034 = vtanh.f32 %v557_v28 }
  0xf8   :  { %v1013_v33 = vpop.eup %1012  ;;  %749 = vst.msk [vmem:[%s1598_s3 + $0x120] sm:$0xff] %vm712_vm1, %v1011_v30  ;;  %v569_v38 = vpop.f32.mrb[13].mxu1  ;;  %v442_v40 = vadd.f32 %v1273_v34, %v441_v37  ;;  %1036 = vtanh.f32 %v450_v35 }
  0xf9   :  { %v1015_v39 = vpop.eup %1014  ;;  %720 = vst.msk [vmem:[%s1598_s3 + $0x38] sm:$0xff] %vm712_vm1, %v1013_v33  ;;  %v570_v41 = vadd.f32 %v1273_v34, %v569_v38  ;;  %v901_v42 = vpop.f32.mrb[14].mxu0  ;;  %1038 = vtanh.f32 %v578_v36 }
  0xfa   :  { %v933_v43 = vpop.f32.mrb[14].mxu1  ;;  %v1017_v44 = vpop.eup %1016  ;;  %752 = vst.msk [vmem:[%s1598_s3 + $0x138] sm:$0xff] %vm712_vm1, %v1015_v39  ;;  %v453_v45 = vadd.f32 %v901_v42, %v1273_v34  ;;  %1040 = vtanh.f32 %v442_v40 }
  0xfb   :  { %v444_v46 = vpop.f32.mrb[15].mxu0  ;;  %v572_v47 = vpop.f32.mrb[15].mxu1  ;;  %718 = vst.msk [vmem:[%s1598_s3 + $0x28] sm:$0xff] %vm712_vm1, %v1017_v44  ;;  %v581_v49 = vadd.f32 %v933_v43, %v1273_v34  ;;  %1042 = vtanh.f32 %v570_v41 }
  0xfc   :  { %v1019_v48 = vpop.eup %1018  ;;  %v445_v51 = vadd.f32 %v1273_v34, %v444_v46  ;;  %v573_v53 = vadd.f32 %v1273_v34, %v572_v47  ;;  %1044 = vtanh.f32 %v453_v45 }
  0xfd   :  { %v1021_v50 = vpop.eup %1020  ;;  %750 = vst.msk [vmem:[%s1598_s3 + $0x128] sm:$0xff] %vm712_vm1, %v1019_v48  ;;  %1046 = vtanh.f32 %v581_v49  ;;  %v904_v56 = vpop.f32.mrb[16].mxu0 }
  0xfe   :  { %v1023_v52 = vpop.eup %1022  ;;  %723 = vst.msk [vmem:[%s1598_s3 + $0x50] sm:$0xff] %vm712_vm1, %v1021_v50  ;;  %v936_v57 = vpop.f32.mrb[16].mxu1  ;;  %1048 = vtanh.f32 %v445_v51  ;;  %v466_v59 = vadd.f32 %v904_v56, %v1273_v34 }
  0xff   :  { %v1025_v54 = vpop.eup %1024  ;;  %755 = vst.msk [vmem:[%s1598_s3 + $0x150] sm:$0xff] %vm712_vm1, %v1023_v52  ;;  %v594_v60 = vadd.f32 %v936_v57, %v1273_v34  ;;  %v457_v61 = vpop.f32.mrb[17].mxu0  ;;  %1050 = vtanh.f32 %v573_v53 }
 0x100   :  { %v1027_v55 = vpop.eup %1026  ;;  %721 = vst.msk [vmem:[%s1598_s3 + $0x40] sm:$0xff] %vm712_vm1, %v1025_v54  ;;  %v585_v62 = vpop.f32.mrb[17].mxu1  ;;  %v458_v0 = vadd.f32 %v1273_v34, %v457_v61  ;;  %1052 = vtanh.f32 %v466_v59 }
 0x101   :  { %v1029_v58 = vpop.eup %1028  ;;  %753 = vst.msk [vmem:[%s1598_s3 + $0x140] sm:$0xff] %vm712_vm1, %v1027_v55  ;;  %v586_v1 = vadd.f32 %v1273_v34, %v585_v62  ;;  %v905_v2 = vpop.f32.mrb[18].mxu0  ;;  %1054 = vtanh.f32 %v594_v60 }
 0x102   :  { %v1031_v63 = vpop.eup %1030  ;;  %724 = vst.msk [vmem:[%s1598_s3 + $0x58] sm:$0xff] %vm712_vm1, %v1029_v58  ;;  %v937_v3 = vpop.f32.mrb[18].mxu1  ;;  %v469_v5 = vadd.f32 %v905_v2, %v1273_v34  ;;  %1056 = vtanh.f32 %v458_v0 }
 0x103   :  { %v1033_v4 = vpop.eup %1032  ;;  %756 = vst.msk [vmem:[%s1598_s3 + $0x158] sm:$0xff] %vm712_vm1, %v1031_v63  ;;  %v460_v6 = vpop.f32.mrb[19].mxu0  ;;  %v597_v9 = vadd.f32 %v937_v3, %v1273_v34  ;;  %1058 = vtanh.f32 %v586_v1 }
 0x104   :  { %v588_v7 = vpop.f32.mrb[19].mxu1  ;;  %v1035_v8 = vpop.eup %1034  ;;  %722 = vst.msk [vmem:[%s1598_s3 + $0x48] sm:$0xff] %vm712_vm1, %v1033_v4  ;;  %v461_v11 = vadd.f32 %v1273_v34, %v460_v6  ;;  %1060 = vtanh.f32 %v469_v5 }
 0x105   :  { %v1037_v10 = vpop.eup %1036  ;;  %754 = vst.msk [vmem:[%s1598_s3 + $0x148] sm:$0xff] %vm712_vm1, %v1035_v8  ;;  %v589_v13 = vadd.f32 %v1273_v34, %v588_v7  ;;  %1062 = vtanh.f32 %v597_v9  ;;  %v908_v16 = vpop.f32.mrb[20].mxu0 }
 0x106   :  { %v1039_v12 = vpop.eup %1038  ;;  %727 = vst.msk [vmem:[%s1598_s3 + $0x70] sm:$0xff] %vm712_vm1, %v1037_v10  ;;  %v940_v17 = vpop.f32.mrb[20].mxu1  ;;  %1064 = vtanh.f32 %v461_v11  ;;  %v482_v19 = vadd.f32 %v908_v16, %v1273_v34 }
 0x107   :  { %v1041_v14 = vpop.eup %1040  ;;  %759 = vst.msk [vmem:[%s1598_s3 + $0x170] sm:$0xff] %vm712_vm1, %v1039_v12  ;;  %v610_v20 = vadd.f32 %v940_v17, %v1273_v34  ;;  %v473_v21 = vpop.f32.mrb[21].mxu0  ;;  %1066 = vtanh.f32 %v589_v13 }
 0x108   :  { %v1043_v15 = vpop.eup %1042  ;;  %725 = vst.msk [vmem:[%s1598_s3 + $0x60] sm:$0xff] %vm712_vm1, %v1041_v14  ;;  %v601_v22 = vpop.f32.mrb[21].mxu1  ;;  %v474_v24 = vadd.f32 %v1273_v34, %v473_v21  ;;  %1068 = vtanh.f32 %v482_v19 }
 0x109   :  { %v1045_v18 = vpop.eup %1044  ;;  %757 = vst.msk [vmem:[%s1598_s3 + $0x160] sm:$0xff] %vm712_vm1, %v1043_v15  ;;  %v602_v25 = vadd.f32 %v1273_v34, %v601_v22  ;;  %v909_v26 = vpop.f32.mrb[22].mxu0  ;;  %1070 = vtanh.f32 %v610_v20 }
 0x10a   :  { %v1047_v23 = vpop.eup %1046  ;;  %728 = vst.msk [vmem:[%s1598_s3 + $0x78] sm:$0xff] %vm712_vm1, %v1045_v18  ;;  %v941_v27 = vpop.f32.mrb[22].mxu1  ;;  %v485_v29 = vadd.f32 %v909_v26, %v1273_v34  ;;  %1072 = vtanh.f32 %v474_v24 }
 0x10b   :  { %v1049_v28 = vpop.eup %1048  ;;  %760 = vst.msk [vmem:[%s1598_s3 + $0x178] sm:$0xff] %vm712_vm1, %v1047_v23  ;;  %v476_v30 = vpop.f32.mrb[23].mxu0  ;;  %v613_v33 = vadd.f32 %v941_v27, %v1273_v34  ;;  %1074 = vtanh.f32 %v602_v25 }
 0x10c   :  { %v604_v31 = vpop.f32.mrb[23].mxu1  ;;  %v1051_v32 = vpop.eup %1050  ;;  %726 = vst.msk [vmem:[%s1598_s3 + $0x68] sm:$0xff] %vm712_vm1, %v1049_v28  ;;  %v477_v36 = vadd.f32 %v1273_v34, %v476_v30  ;;  %1076 = vtanh.f32 %v485_v29 }
 0x10d   :  { %v1053_v35 = vpop.eup %1052  ;;  %758 = vst.msk [vmem:[%s1598_s3 + $0x168] sm:$0xff] %vm712_vm1, %v1051_v32  ;;  %v605_v38 = vadd.f32 %v1273_v34, %v604_v31  ;;  %1078 = vtanh.f32 %v613_v33  ;;  %v912_v41 = vpop.f32.mrb[24].mxu0 }
 0x10e   :  { %v1055_v37 = vpop.eup %1054  ;;  %731 = vst.msk [vmem:[%s1598_s3 + $0x90] sm:$0xff] %vm712_vm1, %v1053_v35  ;;  %v944_v42 = vpop.f32.mrb[24].mxu1  ;;  %1080 = vtanh.f32 %v477_v36  ;;  %v498_v44 = vadd.f32 %v912_v41, %v1273_v34 }
 0x10f   :  { %v1057_v39 = vpop.eup %1056  ;;  %763 = vst.msk [vmem:[%s1598_s3 + $0x190] sm:$0xff] %vm712_vm1, %v1055_v37  ;;  %v626_v45 = vadd.f32 %v944_v42, %v1273_v34  ;;  %v489_v46 = vpop.f32.mrb[25].mxu0  ;;  %1082 = vtanh.f32 %v605_v38 }
 0x110   :  { %v1059_v40 = vpop.eup %1058  ;;  %729 = vst.msk [vmem:[%s1598_s3 + $0x80] sm:$0xff] %vm712_vm1, %v1057_v39  ;;  %v617_v47 = vpop.f32.mrb[25].mxu1  ;;  %v490_v49 = vadd.f32 %v1273_v34, %v489_v46  ;;  %1084 = vtanh.f32 %v498_v44 }
 0x111   :  { %v1061_v43 = vpop.eup %1060  ;;  %761 = vst.msk [vmem:[%s1598_s3 + $0x180] sm:$0xff] %vm712_vm1, %v1059_v40  ;;  %v618_v50 = vadd.f32 %v1273_v34, %v617_v47  ;;  %v913_v51 = vpop.f32.mrb[26].mxu0  ;;  %1086 = vtanh.f32 %v626_v45 }
 0x112   :  { %v1063_v48 = vpop.eup %1062  ;;  %732 = vst.msk [vmem:[%s1598_s3 + $0x98] sm:$0xff] %vm712_vm1, %v1061_v43  ;;  %v945_v52 = vpop.f32.mrb[26].mxu1  ;;  %v501_v54 = vadd.f32 %v913_v51, %v1273_v34  ;;  %1088 = vtanh.f32 %v490_v49 }
 0x113   :  { %v1065_v53 = vpop.eup %1064  ;;  %764 = vst.msk [vmem:[%s1598_s3 + $0x198] sm:$0xff] %vm712_vm1, %v1063_v48  ;;  %v492_v55 = vpop.f32.mrb[27].mxu0  ;;  %v629_v58 = vadd.f32 %v945_v52, %v1273_v34  ;;  %1090 = vtanh.f32 %v618_v50 }
 0x114   :  { %v620_v56 = vpop.f32.mrb[27].mxu1  ;;  %v1067_v57 = vpop.eup %1066  ;;  %730 = vst.msk [vmem:[%s1598_s3 + $0x88] sm:$0xff] %vm712_vm1, %v1065_v53  ;;  %v493_v60 = vadd.f32 %v1273_v34, %v492_v55  ;;  %1092 = vtanh.f32 %v501_v54 }
 0x115   :  { %v1069_v59 = vpop.eup %1068  ;;  %762 = vst.msk [vmem:[%s1598_s3 + $0x188] sm:$0xff] %vm712_vm1, %v1067_v57  ;;  %v621_v62 = vadd.f32 %v1273_v34, %v620_v56  ;;  %1094 = vtanh.f32 %v629_v58  ;;  %v916_v1 = vpop.f32.mrb[28].mxu0 }
 0x116   :  { %v1071_v61 = vpop.eup %1070  ;;  %735 = vst.msk [vmem:[%s1598_s3 + $0xb0] sm:$0xff] %vm712_vm1, %v1069_v59  ;;  %v948_v2 = vpop.f32.mrb[28].mxu1  ;;  %1096 = vtanh.f32 %v493_v60  ;;  %v514_v4 = vadd.f32 %v916_v1, %v1273_v34 }
 0x117   :  { %v1073_v63 = vpop.eup %1072  ;;  %767 = vst.msk [vmem:[%s1598_s3 + $0x1b0] sm:$0xff] %vm712_vm1, %v1071_v61  ;;  %v642_v5 = vadd.f32 %v948_v2, %v1273_v34  ;;  %v505_v6 = vpop.f32.mrb[29].mxu0  ;;  %1098 = vtanh.f32 %v621_v62 }
 0x118   :  { %v1075_v0 = vpop.eup %1074  ;;  %733 = vst.msk [vmem:[%s1598_s3 + $0xa0] sm:$0xff] %vm712_vm1, %v1073_v63  ;;  %v633_v7 = vpop.f32.mrb[29].mxu1  ;;  %v506_v9 = vadd.f32 %v1273_v34, %v505_v6  ;;  %1100 = vtanh.f32 %v514_v4 }
 0x119   :  { %v1077_v3 = vpop.eup %1076  ;;  %765 = vst.msk [vmem:[%s1598_s3 + $0x1a0] sm:$0xff] %vm712_vm1, %v1075_v0  ;;  %v634_v10 = vadd.f32 %v1273_v34, %v633_v7  ;;  %v917_v11 = vpop.f32.mrb[30].mxu0  ;;  %1102 = vtanh.f32 %v642_v5 }
 0x11a   :  { %v1079_v8 = vpop.eup %1078  ;;  %736 = vst.msk [vmem:[%s1598_s3 + $0xb8] sm:$0xff] %vm712_vm1, %v1077_v3  ;;  %v949_v12 = vpop.f32.mrb[30].mxu1  ;;  %v517_v14 = vadd.f32 %v917_v11, %v1273_v34  ;;  %1104 = vtanh.f32 %v506_v9 }
 0x11b   :  { %v1081_v13 = vpop.eup %1080  ;;  %768 = vst.msk [vmem:[%s1598_s3 + $0x1b8] sm:$0xff] %vm712_vm1, %v1079_v8  ;;  %v508_v15 = vpop.f32.mrb[31].mxu0  ;;  %v645_v18 = vadd.f32 %v949_v12, %v1273_v34  ;;  %1106 = vtanh.f32 %v634_v10 }
 0x11c   :  { %v636_v16 = vpop.f32.mrb[31].mxu1  ;;  %v1083_v17 = vpop.eup %1082  ;;  %734 = vst.msk [vmem:[%s1598_s3 + $0xa8] sm:$0xff] %vm712_vm1, %v1081_v13  ;;  %v509_v20 = vadd.f32 %v1273_v34, %v508_v15  ;;  %1108 = vtanh.f32 %v517_v14 }
 0x11d   :  { %v1085_v19 = vpop.eup %1084  ;;  %766 = vst.msk [vmem:[%s1598_s3 + $0x1a8] sm:$0xff] %vm712_vm1, %v1083_v17  ;;  %v637_v22 = vadd.f32 %v1273_v34, %v636_v16  ;;  %1110 = vtanh.f32 %v645_v18 }
 0x11e   :  { %v1087_v21 = vpop.eup %1086  ;;  %739 = vst.msk [vmem:[%s1598_s3 + $0xd0] sm:$0xff] %vm712_vm1, %v1085_v19  ;;  %1112 = vtanh.f32 %v509_v20 }
 0x11f   :  { %v1089_v23 = vpop.eup %1088  ;;  %771 = vst.msk [vmem:[%s1598_s3 + $0x1d0] sm:$0xff] %vm712_vm1, %v1087_v21  ;;  %1114 = vtanh.f32 %v637_v22 }
 0x120   :  { %v1091_v24 = vpop.eup %1090  ;;  %737 = vst.msk [vmem:[%s1598_s3 + $0xc0] sm:$0xff] %vm712_vm1, %v1089_v23 }
 0x121   :  { %v1093_v25 = vpop.eup %1092  ;;  %769 = vst.msk [vmem:[%s1598_s3 + $0x1c0] sm:$0xff] %vm712_vm1, %v1091_v24 }
 0x122   :  { %v1095_v34 = vpop.eup %1094  ;;  %740 = vst.msk [vmem:[%s1598_s3 + $0xd8] sm:$0xff] %vm712_vm1, %v1093_v25 }
 0x123   :  { %v1097_v26 = vpop.eup %1096  ;;  %772 = vst.msk [vmem:[%s1598_s3 + $0x1d8] sm:$0xff] %vm712_vm1, %v1095_v34 }
 0x124   :  { %v1099_v27 = vpop.eup %1098  ;;  %738 = vst.msk [vmem:[%s1598_s3 + $0xc8] sm:$0xff] %vm712_vm1, %v1097_v26 }
 0x125   :  { %v1101_v28 = vpop.eup %1100  ;;  %770 = vst.msk [vmem:[%s1598_s3 + $0x1c8] sm:$0xff] %vm712_vm1, %v1099_v27 }
 0x126   :  { %v1103_v29 = vpop.eup %1102  ;;  %743 = vst.msk [vmem:[%s1598_s3 + $0xf0] sm:$0xff] %vm712_vm1, %v1101_v28 }
 0x127   :  { %v1105_v30 = vpop.eup %1104  ;;  %775 = vst.msk [vmem:[%s1598_s3 + $0x1f0] sm:$0xff] %vm712_vm1, %v1103_v29 }
 0x128   :  { %v1107_v31 = vpop.eup %1106  ;;  %741 = vst.msk [vmem:[%s1598_s3 + $0xe0] sm:$0xff] %vm712_vm1, %v1105_v30 }
 0x129   :  { %v1109_v32 = vpop.eup %1108  ;;  %773 = vst.msk [vmem:[%s1598_s3 + $0x1e0] sm:$0xff] %vm712_vm1, %v1107_v31 }
 0x12a   :  { %v1111_v33 = vpop.eup %1110  ;;  %744 = vst.msk [vmem:[%s1598_s3 + $0xf8] sm:$0xff] %vm712_vm1, %v1109_v32 }
 0x12b   :  { %v1113_v35 = vpop.eup %1112  ;;  %776 = vst.msk [vmem:[%s1598_s3 + $0x1f8] sm:$0xff] %vm712_vm1, %v1111_v33 }
 0x12c   :  { %v1115_v36 = vpop.eup %1114  ;;  %742 = vst.msk [vmem:[%s1598_s3 + $0xe8] sm:$0xff] %vm712_vm1, %v1113_v35 }
 0x12d   :  { %774 = vst.msk [vmem:[%s1598_s3 + $0x1e8] sm:$0xff] %vm712_vm1, %v1115_v36 }

</bundles_post_ra>
